<compile_context>
chip_gen: v6e
topology: v6e:2x2x1
jax: 0.10.0
libtpu: 0.0.40
codegen_flags: <defaults>
</compile_context>

<pallas_src>
import functools

import jax
import jax.numpy as jnp
from jax import lax
from jax.experimental import pallas as pl
from jax.experimental.pallas import tpu as pltpu


# ---------------------------------------------------------------------------
# Kernel
# ---------------------------------------------------------------------------
def _bottleneck_kernel(x_ref, halo_ref, w1_ref, b1_ref, w2_ref, b2_ref,
                       w3_ref, b3_ref, o_ref, *, per_ky):
    TH, W, Cin = x_ref.shape           # x block: (tile_h, W, Cin) bf16
    P = w1_ref.shape[-1]
    i = pl.program_id(1)               # H-tile index
    nh = pl.num_programs(1)

    x = x_ref[...]                     # bf16; also the residual
    halo = halo_ref[...]               # (2, W, Cin) bf16: rows i*TH-1, (i+1)*TH

    # ---- conv1 (1x1, BN scale folded) + bias + ReLU --------------------------
    # Two matmuls (body + halo rows) instead of concatenating x with its halo;
    # the single full-tile assembly happens at the h1 level with the border
    # zeroing folded in.
    w1 = w1_ref[...]
    b1 = b1_ref[...]
    h1b = jnp.dot(x.reshape(TH * W, Cin), w1, preferred_element_type=jnp.float32)
    h1b = jnp.maximum(h1b + b1, 0.0).reshape(TH, W, P)
    h1h = jnp.dot(halo.reshape(2 * W, Cin), w1, preferred_element_type=jnp.float32)
    h1h = jnp.maximum(h1h + b1, 0.0).reshape(2, W, P)
    # conv2 zero-pads h1 (not x): halo rows outside the image were computed
    # from zero rows (-> relu(b1)); force them to exactly zero.
    top = h1h[0:1] * (i > 0).astype(jnp.float32)
    bot = h1h[1:2] * (i < nh - 1).astype(jnp.float32)
    h1 = jnp.concatenate([top, h1b, bot], axis=0)         # (TH+2, W, P) f32

    # ---- conv2 (3x3, pad=1): W shift on the XLU + hoisted border mask,
    #      H shift via row slices of the halo-extended tile --------------------
    # TODO(synk): on v6e/v7x, hold h1 in bf16 through the shift stage once bf16
    #             sublane rotate is confirmed supported by Mosaic.
    col = lax.broadcasted_iota(jnp.int32, (1, W, 1), 1)    # hoisted once
    edge = (col == 0, col == W - 1)                        # wrap cols for dx=-1/+1
    shifted = []
    for dx in (-1, 0, 1):                                  # dx = kx - 1
        if dx == 0:
            r = h1
        else:
            r = pltpu.roll(h1, shift=(-dx) % W, axis=1)    # r[w] = h1[w + dx]
            r = jnp.where(edge[0] if dx == -1 else edge[1], 0.0, r)
        shifted.append(r.astype(jnp.bfloat16))

    w2 = w2_ref[...]                                       # (9P, P), rows (ky,kx,cin)
    if per_ky:
        # Three matmuls with K = 3P: skips the (TH, W, 9P) im2col stack.
        h2 = jnp.zeros((TH * W, P), jnp.float32)
        for ky in range(3):
            stack = jnp.concatenate(
                [shifted[kx][ky:ky + TH] for kx in range(3)],
                axis=-1).reshape(TH * W, 3 * P)
            h2 = h2 + jnp.dot(stack, w2[ky * 3 * P:(ky + 1) * 3 * P, :],
                              preferred_element_type=jnp.float32)
    else:
        # Single big-K matmul (K = 9P) for small P.
        taps = [shifted[kx][ky:ky + TH] for ky in range(3) for kx in range(3)]
        stack = jnp.concatenate(taps, axis=-1).reshape(TH * W, 9 * P)
        h2 = jnp.dot(stack, w2, preferred_element_type=jnp.float32)
    h2 = jnp.maximum(h2 + b2_ref[...], 0.0).astype(jnp.bfloat16)

    # ---- conv3 (1x1) + bias + residual + ReLU; bf16 store ---------------------
    h3 = jnp.dot(h2, w3_ref[...], preferred_element_type=jnp.float32)
    h3 = h3 + b3_ref[...] + x.reshape(TH * W, Cin).astype(jnp.float32)
    o_ref[...] = jnp.maximum(h3, 0.0).astype(jnp.bfloat16).reshape(TH, W, -1)


# ---------------------------------------------------------------------------
# Tiling / VMEM heuristics
# ---------------------------------------------------------------------------
def _vmem_limit_bytes():
    cap = 128 << 20
    try:
        info = pltpu.get_tpu_info()
        cap = int(getattr(info, "vmem_capacity_bytes", cap)) or cap
    except Exception:
        pass
    # v5e/v6e (128 MiB) -> 96 MiB scoped limit; v7x (64 MiB) -> 48 MiB.
    return min(cap * 3 // 4, 100 << 20)


def _vmem_estimate(tile_h, W, Cin, P, Cout, per_ky):
    th = tile_h
    blocks = 2 * (th * W * Cin * 2 + 2 * W * Cin * 2 + th * W * Cout * 2)
    weights = 2 * ((Cin * P + 9 * P * P + P * Cout) * 2 + (2 * P + Cout) * 4)
    h1 = (th + 2) * W * P * 4 + 3 * (th + 2) * W * P * 2   # f32 h1 + bf16 taps
    stack = th * W * (3 if per_ky else 9) * P * 2
    acc = th * W * max(P, Cout) * 4
    return blocks + weights + h1 + stack + acc


def _pick_tile_h(N, H, W, Cin, P, Cout, per_ky, budget):
    divs = sorted((d for d in range(1, H + 1) if H % d == 0), reverse=True)
    fits = [d for d in divs
            if d <= 256 and _vmem_estimate(d, W, Cin, P, Cout, per_ky) <= budget]
    if not fits:
        return divs[-1]
    if N == 1:  # keep >= 2 grid points so both v7x TensorCores stay busy
        multi = [d for d in fits if H // d >= 2]
        if multi:
            return multi[0]
    return fits[0]


# ---------------------------------------------------------------------------
# Wrappers
# ---------------------------------------------------------------------------
def bottleneck_pallas_nhwc(x_nhwc, folded, *, tile_h=None, conv2_per_ky=None):
    """Fused Bottleneck: NHWC bf16 in -> NHWC bf16 out (identity residual)."""
    w1, b1, w2_hwio, b2, w3, b3 = folded
    N, H, W, Cin = x_nhwc.shape
    P = w1.shape[1]
    Cout = w3.shape[1]
    assert Cout == Cin, "identity residual requires inplanes == planes * 4"
    assert W % 8 == 0  # TODO(synk): ragged W tiling

    x = x_nhwc if x_nhwc.dtype == jnp.bfloat16 else x_nhwc.astype(jnp.bfloat16)

    if conv2_per_ky is None:
        # Once K >= MXU depth the 9P im2col stack buys nothing; save the VMEM.
        conv2_per_ky = P >= 128
    vmem_limit = _vmem_limit_bytes()
    if tile_h is None:
        tile_h = _pick_tile_h(N, H, W, Cin, P, Cout, conv2_per_ky, vmem_limit // 2)
    assert H % tile_h == 0, "tile_h must divide H"  # TODO(synk): ragged H tiling
    nh = H // tile_h

    # 2-row halo per tile (rows i*tile_h - 1 and (i+1)*tile_h; zero outside the
    # image) built from two cheap strided slices -- no full-tensor pad pass.
    zero_row = jnp.zeros((N, 1, W, Cin), x.dtype)
    if nh > 1:
        tops = jnp.concatenate([zero_row, x[:, tile_h - 1:H - 1:tile_h]], axis=1)
        bots = jnp.concatenate([x[:, tile_h:H:tile_h], zero_row], axis=1)
    else:
        tops, bots = zero_row, zero_row
    halo = jnp.stack([tops, bots], axis=2)                # (N, nh, 2, W, Cin)

    w2k = w2_hwio.reshape(9 * P, P)                       # rows ordered (ky, kx, cin)
    b1r, b2r, b3r = b1.reshape(1, P), b2.reshape(1, P), b3.reshape(1, Cout)

    # TODO(synk): on v7x, add pipeline_mode=pl.Buffered(1) to the grid-invariant
    #             weight/bias specs below to single-buffer them (halves their VMEM).
    # TODO(synk): for sub-128 P on v6e/v7x, pad P up to the 128-lane quantum in the
    #             wrapper to avoid lane relayout during the tap concat.
    full = lambda s: pl.BlockSpec(s, lambda n, i: (0,) * len(s))

    flops = 2 * N * H * W * (Cin * P + 9 * P * P + P * Cout)
    bytes_accessed = int(x.size * 2 + halo.size * 2 + N * H * W * Cout * 2
                         + (w1.size + w2k.size + w3.size) * 2
                         + (b1.size + b2.size + b3.size) * 4)

    return pl.pallas_call(
        functools.partial(_bottleneck_kernel, per_ky=conv2_per_ky),
        out_shape=jax.ShapeDtypeStruct((N, H, W, Cout), jnp.bfloat16),
        grid_spec=pltpu.PrefetchScalarGridSpec(
            num_scalar_prefetch=0,
            grid=(N, nh),
            in_specs=[
                pl.BlockSpec((None, tile_h, W, Cin), lambda n, i: (n, i, 0, 0)),
                pl.BlockSpec((None, None, 2, W, Cin),
                             lambda n, i: (n, i, 0, 0, 0)),
                full((Cin, P)), full((1, P)),
                full((9 * P, P)), full((1, P)),
                full((P, Cout)), full((1, Cout)),
            ],
            out_specs=pl.BlockSpec((None, tile_h, W, Cout),
                                   lambda n, i: (n, i, 0, 0)),
        ),
        compiler_params=pltpu.CompilerParams(
            dimension_semantics=("parallel", "parallel"),
            vmem_limit_bytes=int(vmem_limit)),
        cost_estimate=pl.CostEstimate(
            flops=flops, transcendentals=0, bytes_accessed=bytes_accessed),
    )(x, halo, w1, b1r, w2k, b2r, w3, b3r)


def bottleneck_pallas(x_nchw, folded, **kwargs):
    """PyTorch-parity entry point (NCHW in / NCHW out, input dtype preserved)."""
    # TODO(synk): keep the surrounding network in NHWC bf16 and call
    #             bottleneck_pallas_nhwc directly; these transposes/casts are
    #             parity-only convenience.
    x = jnp.transpose(x_nchw, (0, 2, 3, 1))
    out = bottleneck_pallas_nhwc(x, folded, **kwargs)
    return jnp.transpose(out, (0, 3, 1, 2)).astype(x_nchw.dtype)


# ---------------------------------------------------------------------------
# Plain-JAX reference & parameter construction
# ---------------------------------------------------------------------------
def bottleneck_reference(x_nchw, folded):
    """Plain-JAX reference using the same bf16-operand / f32-accumulate math."""
    w1, b1, w2_hwio, b2, w3, b3 = folded
    x = jnp.transpose(x_nchw, (0, 2, 3, 1)).astype(jnp.bfloat16)
    h = jnp.einsum('nhwc,cp->nhwp', x, w1, preferred_element_type=jnp.float32)
    h = jnp.maximum(h + b1, 0.0)
    h = lax.conv_general_dilated(
        h.astype(jnp.bfloat16), w2_hwio, window_strides=(1, 1), padding='SAME',
        dimension_numbers=('NHWC', 'HWIO', 'NHWC'),
        preferred_element_type=jnp.float32)
    h = jnp.maximum(h + b2, 0.0)
    h = jnp.einsum('nhwp,pq->nhwq', h.astype(jnp.bfloat16), w3,
                   preferred_element_type=jnp.float32)
    h = jnp.maximum(h + b3 + x.astype(jnp.float32), 0.0)
    return jnp.transpose(h, (0, 3, 1, 2))


def make_params(key, inplanes, planes, eps=1e-5):
    """Random Conv + BN(eval) params with BN folded: scale into bf16 conv
    weights, per-channel bias kept in f32."""
    ks = jax.random.split(key, 15)
    outp = planes * 4

    def bn(kg, kb, km, kv, c):
        gamma = 1.0 + 0.1 * jax.random.normal(kg, (c,), jnp.float32)
        beta = 0.1 * jax.random.normal(kb, (c,), jnp.float32)
        mean = 0.1 * jax.random.normal(km, (c,), jnp.float32)
        var = 0.5 + jax.random.uniform(kv, (c,), jnp.float32)
        scale = gamma / jnp.sqrt(var + eps)
        return scale, beta - mean * scale

    w1 = 0.1 * jax.random.normal(ks[0], (inplanes, planes), jnp.float32)
    w2 = 0.1 * jax.random.normal(ks[1], (3, 3, planes, planes), jnp.float32)  # HWIO
    w3 = 0.1 * jax.random.normal(ks[2], (planes, outp), jnp.float32)
    s1, b1 = bn(ks[3], ks[4], ks[5], ks[6], planes)
    s2, b2 = bn(ks[7], ks[8], ks[9], ks[10], planes)
    s3, b3 = bn(ks[11], ks[12], ks[13], ks[14], outp)

    w1f = (w1 * s1[None, :]).astype(jnp.bfloat16)
    w2f = (w2 * s2[None, None, None, :]).astype(jnp.bfloat16)
    w3f = (w3 * s3[None, :]).astype(jnp.bfloat16)
    return (w1f, b1, w2f, b2, w3f, b3)


if __name__ == "__main__":
    key = jax.random.PRNGKey(0)
    kx, kp = jax.random.split(key)

    N, planes, H, W = 2, 32, 16, 16
    inplanes = planes * 4                 # identity residual; Cout = 128 lanes
    x = jax.random.normal(kx, (N, inplanes, H, W), jnp.float32)   # NCHW input
    folded = make_params(kp, inplanes, planes)

    ref = jax.block_until_ready(bottleneck_reference(x, folded))

    # 1) PyTorch-parity NCHW path; auto strategy (big-K im2col conv2 for P=32),
    #    auto tile_h / VMEM limit.
    out = jax.block_until_ready(jax.jit(bottleneck_pallas)(x, folded))
    assert out.shape == (N, inplanes, H, W)
    err = float(jnp.max(jnp.abs(out - ref)))
    assert jnp.allclose(out, ref, atol=5e-2, rtol=5e-2), err

    # 2) Optimized NHWC bf16 path, forcing the per-ky conv2 strategy and an
    #    H-tiled grid (nh = 2) to exercise the halo / border-zeroing logic.
    x_nhwc = jnp.transpose(x, (0, 2, 3, 1)).astype(jnp.bfloat16)
    run2 = jax.jit(lambda a, p: bottleneck_pallas_nhwc(a, p, tile_h=8,
                                                       conv2_per_ky=True))
    out2 = jax.block_until_ready(run2(x_nhwc, folded))
    assert out2.dtype == jnp.bfloat16
    ref_nhwc = jnp.transpose(ref, (0, 2, 3, 1))
    err2 = float(jnp.max(jnp.abs(out2.astype(jnp.float32) - ref_nhwc)))
    assert jnp.allclose(out2.astype(jnp.float32), ref_nhwc,
                        atol=5e-2, rtol=5e-2), err2

    print("KERNEL_OK")
</pallas_src>

<mosaic_0001>
module attributes {stable_mosaic.version = 11 : i64} {
  func.func @_bottleneck_kernel(%arg0: i32, %arg1: i32, %arg2: memref<1x16x16x128xbf16, #tpu.memory_space<vmem>>, %arg3: memref<1x1x2x16x128xbf16, #tpu.memory_space<vmem>>, %arg4: memref<128x32xbf16, #tpu.memory_space<vmem>>, %arg5: memref<1x32xf32, #tpu.memory_space<vmem>>, %arg6: memref<288x32xbf16, #tpu.memory_space<vmem>>, %arg7: memref<1x32xf32, #tpu.memory_space<vmem>>, %arg8: memref<32x128xbf16, #tpu.memory_space<vmem>>, %arg9: memref<1x128xf32, #tpu.memory_space<vmem>>, %arg10: memref<1x16x16x128xbf16, #tpu.memory_space<vmem>>) attributes {dimension_semantics = [#tpu.dimension_semantics<parallel>, #tpu.dimension_semantics<parallel>], iteration_bounds = array<i64: 2, 1>, scalar_prefetch = 0 : i64, scratch_operands = 0 : i64, tpu.core_type = #tpu.core_type<tc>, window_params = [{transform_indices = @transform_0, window_bounds = array<i64: 1, 16, 16, 128>}, {transform_indices = @transform_1, window_bounds = array<i64: 1, 1, 2, 16, 128>}, {pipeline_mode = #tpu.pipeline_mode<synchronous>, transform_indices = @transform_2, window_bounds = array<i64: 128, 32>}, {pipeline_mode = #tpu.pipeline_mode<synchronous>, transform_indices = @transform_3, window_bounds = array<i64: 1, 32>}, {pipeline_mode = #tpu.pipeline_mode<synchronous>, transform_indices = @transform_4, window_bounds = array<i64: 288, 32>}, {pipeline_mode = #tpu.pipeline_mode<synchronous>, transform_indices = @transform_5, window_bounds = array<i64: 1, 32>}, {pipeline_mode = #tpu.pipeline_mode<synchronous>, transform_indices = @transform_6, window_bounds = array<i64: 32, 128>}, {pipeline_mode = #tpu.pipeline_mode<synchronous>, transform_indices = @transform_7, window_bounds = array<i64: 1, 128>}, {transform_indices = @transform_8, window_bounds = array<i64: 1, 16, 16, 128>}]} {
    %c0 = arith.constant 0 : index
    %c0_0 = arith.constant 0 : index
    %c0_1 = arith.constant 0 : index
    %c0_2 = arith.constant 0 : index
    %0 = vector.load %arg2[%c0, %c0_0, %c0_1, %c0_2] : memref<1x16x16x128xbf16, #tpu.memory_space<vmem>>, vector<1x16x16x128xbf16>
    %1 = vector.shape_cast %0 : vector<1x16x16x128xbf16> to vector<16x16x128xbf16>
    %c0_3 = arith.constant 0 : index
    %c0_4 = arith.constant 0 : index
    %c0_5 = arith.constant 0 : index
    %c0_6 = arith.constant 0 : index
    %c0_7 = arith.constant 0 : index
    %2 = vector.load %arg3[%c0_3, %c0_4, %c0_5, %c0_6, %c0_7] : memref<1x1x2x16x128xbf16, #tpu.memory_space<vmem>>, vector<1x1x2x16x128xbf16>
    %3 = vector.shape_cast %2 : vector<1x1x2x16x128xbf16> to vector<2x16x128xbf16>
    %c0_8 = arith.constant 0 : index
    %c0_9 = arith.constant 0 : index
    %4 = vector.load %arg4[%c0_8, %c0_9] : memref<128x32xbf16, #tpu.memory_space<vmem>>, vector<128x32xbf16>
    %c0_10 = arith.constant 0 : index
    %c0_11 = arith.constant 0 : index
    %5 = vector.load %arg5[%c0_10, %c0_11] : memref<1x32xf32, #tpu.memory_space<vmem>>, vector<1x32xf32>
    %6 = vector.shape_cast %1 : vector<16x16x128xbf16> to vector<256x128xbf16>
    %cst = arith.constant dense<0.000000e+00> : vector<256x32xf32>
    %7 = tpu.matmul %6, %4, %cst {dimension_numbers = #tpu.dot_dimension_numbers<[1], [0], [0], [1], [0, 0, 1, 1], [], []>} : vector<256x128xbf16>, vector<128x32xbf16>, vector<256x32xf32> -> vector<256x32xf32>
    %8 = vector.broadcast %5 : vector<1x32xf32> to vector<256x32xf32>
    %9 = arith.addf %7, %8 : vector<256x32xf32>
    %cst_12 = arith.constant 0.000000e+00 : f32
    %10 = vector.broadcast %cst_12 : f32 to vector<256x32xf32>
    %11 = arith.maximumf %9, %10 : vector<256x32xf32>
    %12 = vector.shape_cast %11 : vector<256x32xf32> to vector<16x16x32xf32>
    %13 = vector.shape_cast %3 : vector<2x16x128xbf16> to vector<32x128xbf16>
    %cst_13 = arith.constant dense<0.000000e+00> : vector<32x32xf32>
    %14 = tpu.matmul %13, %4, %cst_13 {dimension_numbers = #tpu.dot_dimension_numbers<[1], [0], [0], [1], [0, 0, 1, 1], [], []>} : vector<32x128xbf16>, vector<128x32xbf16>, vector<32x32xf32> -> vector<32x32xf32>
    %15 = vector.broadcast %5 : vector<1x32xf32> to vector<32x32xf32>
    %16 = arith.addf %14, %15 : vector<32x32xf32>
    %cst_14 = arith.constant 0.000000e+00 : f32
    %17 = vector.broadcast %cst_14 : f32 to vector<32x32xf32>
    %18 = arith.maximumf %16, %17 : vector<32x32xf32>
    %19 = vector.shape_cast %18 : vector<32x32xf32> to vector<2x16x32xf32>
    %20 = vector.extract_strided_slice %19 {offsets = [0, 0, 0], sizes = [1, 16, 32], strides = [1, 1, 1]} : vector<2x16x32xf32> to vector<1x16x32xf32>
    %c0_i32 = arith.constant 0 : i32
    %21 = arith.cmpi sgt, %arg1, %c0_i32 : i32
    %22 = arith.extui %21 : i1 to i32
    %23 = arith.sitofp %22 : i32 to f32
    %24 = vector.broadcast %23 : f32 to vector<1x16x32xf32>
    %25 = arith.mulf %20, %24 : vector<1x16x32xf32>
    %26 = vector.extract_strided_slice %19 {offsets = [1, 0, 0], sizes = [1, 16, 32], strides = [1, 1, 1]} : vector<2x16x32xf32> to vector<1x16x32xf32>
    %c0_i32_15 = arith.constant 0 : i32
    %27 = arith.cmpi slt, %arg1, %c0_i32_15 : i32
    %28 = arith.extui %27 : i1 to i32
    %29 = arith.sitofp %28 : i32 to f32
    %30 = vector.broadcast %29 : f32 to vector<1x16x32xf32>
    %31 = arith.mulf %26, %30 : vector<1x16x32xf32>
    %32 = tpu.concatenate %25, %12, %31 in 0 : vector<1x16x32xf32>, vector<16x16x32xf32>, vector<1x16x32xf32> -> vector<18x16x32xf32>
    %33 = tpu.iota {dimensions = array<i32: 1>} : vector<1x16x1xi32>
    %c0_i32_16 = arith.constant 0 : i32
    %34 = vector.broadcast %c0_i32_16 : i32 to vector<1x16x1xi32>
    %35 = arith.cmpi eq, %33, %34 : vector<1x16x1xi32>
    %c15_i32 = arith.constant 15 : i32
    %36 = vector.broadcast %c15_i32 : i32 to vector<1x16x1xi32>
    %37 = arith.cmpi eq, %33, %36 : vector<1x16x1xi32>
    %c1_i32 = arith.constant 1 : i32
    %38 = tpu.dynamic_rotate %32 by %c1_i32 dim 1 : vector<18x16x32xf32>, i32 -> vector<18x16x32xf32>
    %cst_17 = arith.constant 0.000000e+00 : f32
    %39 = vector.shape_cast %35 : vector<1x16x1xi1> to vector<1x16x1xi1>
    %40 = vector.broadcast %39 : vector<1x16x1xi1> to vector<18x16x32xi1>
    %41 = vector.broadcast %cst_17 : f32 to vector<18x16x32xf32>
    %42 = arith.select %40, %41, %38 : vector<18x16x32xi1>, vector<18x16x32xf32>
    %43 = arith.truncf %42 : vector<18x16x32xf32> to vector<18x16x32xbf16>
    %44 = arith.truncf %32 : vector<18x16x32xf32> to vector<18x16x32xbf16>
    %c15_i32_18 = arith.constant 15 : i32
    %45 = tpu.dynamic_rotate %32 by %c15_i32_18 dim 1 : vector<18x16x32xf32>, i32 -> vector<18x16x32xf32>
    %cst_19 = arith.constant 0.000000e+00 : f32
    %46 = vector.shape_cast %37 : vector<1x16x1xi1> to vector<1x16x1xi1>
    %47 = vector.broadcast %46 : vector<1x16x1xi1> to vector<18x16x32xi1>
    %48 = vector.broadcast %cst_19 : f32 to vector<18x16x32xf32>
    %49 = arith.select %47, %48, %45 : vector<18x16x32xi1>, vector<18x16x32xf32>
    %50 = arith.truncf %49 : vector<18x16x32xf32> to vector<18x16x32xbf16>
    %c0_20 = arith.constant 0 : index
    %c0_21 = arith.constant 0 : index
    %51 = vector.load %arg6[%c0_20, %c0_21] : memref<288x32xbf16, #tpu.memory_space<vmem>>, vector<288x32xbf16>
    %52 = vector.extract_strided_slice %43 {offsets = [0, 0, 0], sizes = [16, 16, 32], strides = [1, 1, 1]} : vector<18x16x32xbf16> to vector<16x16x32xbf16>
    %53 = vector.extract_strided_slice %44 {offsets = [0, 0, 0], sizes = [16, 16, 32], strides = [1, 1, 1]} : vector<18x16x32xbf16> to vector<16x16x32xbf16>
    %54 = vector.extract_strided_slice %50 {offsets = [0, 0, 0], sizes = [16, 16, 32], strides = [1, 1, 1]} : vector<18x16x32xbf16> to vector<16x16x32xbf16>
    %55 = vector.extract_strided_slice %43 {offsets = [1, 0, 0], sizes = [16, 16, 32], strides = [1, 1, 1]} : vector<18x16x32xbf16> to vector<16x16x32xbf16>
    %56 = vector.extract_strided_slice %44 {offsets = [1, 0, 0], sizes = [16, 16, 32], strides = [1, 1, 1]} : vector<18x16x32xbf16> to vector<16x16x32xbf16>
    %57 = vector.extract_strided_slice %50 {offsets = [1, 0, 0], sizes = [16, 16, 32], strides = [1, 1, 1]} : vector<18x16x32xbf16> to vector<16x16x32xbf16>
    %58 = vector.extract_strided_slice %43 {offsets = [2, 0, 0], sizes = [16, 16, 32], strides = [1, 1, 1]} : vector<18x16x32xbf16> to vector<16x16x32xbf16>
    %59 = vector.extract_strided_slice %44 {offsets = [2, 0, 0], sizes = [16, 16, 32], strides = [1, 1, 1]} : vector<18x16x32xbf16> to vector<16x16x32xbf16>
    %60 = vector.extract_strided_slice %50 {offsets = [2, 0, 0], sizes = [16, 16, 32], strides = [1, 1, 1]} : vector<18x16x32xbf16> to vector<16x16x32xbf16>
    %61 = tpu.concatenate %52, %53, %54, %55, %56, %57, %58, %59, %60 in 2 : vector<16x16x32xbf16>, vector<16x16x32xbf16>, vector<16x16x32xbf16>, vector<16x16x32xbf16>, vector<16x16x32xbf16>, vector<16x16x32xbf16>, vector<16x16x32xbf16>, vector<16x16x32xbf16>, vector<16x16x32xbf16> -> vector<16x16x288xbf16>
    %62 = vector.shape_cast %61 : vector<16x16x288xbf16> to vector<256x288xbf16>
    %cst_22 = arith.constant dense<0.000000e+00> : vector<256x32xf32>
    %63 = tpu.matmul %62, %51, %cst_22 {dimension_numbers = #tpu.dot_dimension_numbers<[1], [0], [0], [1], [0, 0, 1, 1], [], []>} : vector<256x288xbf16>, vector<288x32xbf16>, vector<256x32xf32> -> vector<256x32xf32>
    %c0_23 = arith.constant 0 : index
    %c0_24 = arith.constant 0 : index
    %64 = vector.load %arg7[%c0_23, %c0_24] : memref<1x32xf32, #tpu.memory_space<vmem>>, vector<1x32xf32>
    %65 = vector.broadcast %64 : vector<1x32xf32> to vector<256x32xf32>
    %66 = arith.addf %63, %65 : vector<256x32xf32>
    %cst_25 = arith.constant 0.000000e+00 : f32
    %67 = vector.broadcast %cst_25 : f32 to vector<256x32xf32>
    %68 = arith.maximumf %66, %67 : vector<256x32xf32>
    %69 = arith.truncf %68 : vector<256x32xf32> to vector<256x32xbf16>
    %c0_26 = arith.constant 0 : index
    %c0_27 = arith.constant 0 : index
    %70 = vector.load %arg8[%c0_26, %c0_27] : memref<32x128xbf16, #tpu.memory_space<vmem>>, vector<32x128xbf16>
    %cst_28 = arith.constant dense<0.000000e+00> : vector<256x128xf32>
    %71 = tpu.matmul %69, %70, %cst_28 {dimension_numbers = #tpu.dot_dimension_numbers<[1], [0], [0], [1], [0, 0, 1, 1], [], []>} : vector<256x32xbf16>, vector<32x128xbf16>, vector<256x128xf32> -> vector<256x128xf32>
    %c0_29 = arith.constant 0 : index
    %c0_30 = arith.constant 0 : index
    %72 = vector.load %arg9[%c0_29, %c0_30] : memref<1x128xf32, #tpu.memory_space<vmem>>, vector<1x128xf32>
    %73 = vector.broadcast %72 : vector<1x128xf32> to vector<256x128xf32>
    %74 = arith.addf %71, %73 : vector<256x128xf32>
    %75 = vector.shape_cast %1 : vector<16x16x128xbf16> to vector<256x128xbf16>
    %76 = arith.extf %75 : vector<256x128xbf16> to vector<256x128xf32>
    %77 = arith.addf %74, %76 : vector<256x128xf32>
    %cst_31 = arith.constant 0.000000e+00 : f32
    %78 = vector.broadcast %cst_31 : f32 to vector<256x128xf32>
    %79 = arith.maximumf %77, %78 : vector<256x128xf32>
    %80 = arith.truncf %79 : vector<256x128xf32> to vector<256x128xbf16>
    %81 = vector.shape_cast %80 : vector<256x128xbf16> to vector<16x16x128xbf16>
    %c0_32 = arith.constant 0 : index
    %c0_33 = arith.constant 0 : index
    %c0_34 = arith.constant 0 : index
    %c0_35 = arith.constant 0 : index
    %82 = vector.load %arg10[%c0_32, %c0_33, %c0_34, %c0_35] : memref<1x16x16x128xbf16, #tpu.memory_space<vmem>>, vector<1x16x16x128xbf16>
    %83 = vector.shape_cast %82 : vector<1x16x16x128xbf16> to vector<16x16x128xbf16>
    %84 = vector.shape_cast %81 : vector<16x16x128xbf16> to vector<1x16x16x128xbf16>
    tpu.vector_store %arg10[%c0_32, %c0_33, %c0_34, %c0_35], %84 {strides = array<i32>} : memref<1x16x16x128xbf16, #tpu.memory_space<vmem>>, vector<1x16x16x128xbf16>,
    return
  }
  func.func @transform_0(%arg0: i32, %arg1: i32) -> (i32, i32, i32, i32) {
    %c0_i32 = arith.constant 0 : i32
    %c0_i32_0 = arith.constant 0 : i32
    %c0_i32_1 = arith.constant 0 : i32
    return %arg0, %arg1, %c0_i32, %c0_i32_0 : i32, i32, i32, i32
  }
  func.func @transform_1(%arg0: i32, %arg1: i32) -> (i32, i32, i32, i32, i32) {
    %c0_i32 = arith.constant 0 : i32
    %c0_i32_0 = arith.constant 0 : i32
    %c0_i32_1 = arith.constant 0 : i32
    %c0_i32_2 = arith.constant 0 : i32
    return %arg0, %arg1, %c0_i32, %c0_i32_0, %c0_i32_1 : i32, i32, i32, i32, i32
  }
  func.func @transform_2(%arg0: i32, %arg1: i32) -> (i32, i32) {
    %c0_i32 = arith.constant 0 : i32
    %c0_i32_0 = arith.constant 0 : i32
    %c0_i32_1 = arith.constant 0 : i32
    return %c0_i32, %c0_i32_0 : i32, i32
  }
  func.func @transform_3(%arg0: i32, %arg1: i32) -> (i32, i32) {
    %c0_i32 = arith.constant 0 : i32
    %c0_i32_0 = arith.constant 0 : i32
    %c0_i32_1 = arith.constant 0 : i32
    return %c0_i32, %c0_i32_0 : i32, i32
  }
  func.func @transform_4(%arg0: i32, %arg1: i32) -> (i32, i32) {
    %c0_i32 = arith.constant 0 : i32
    %c0_i32_0 = arith.constant 0 : i32
    %c0_i32_1 = arith.constant 0 : i32
    return %c0_i32, %c0_i32_0 : i32, i32
  }
  func.func @transform_5(%arg0: i32, %arg1: i32) -> (i32, i32) {
    %c0_i32 = arith.constant 0 : i32
    %c0_i32_0 = arith.constant 0 : i32
    %c0_i32_1 = arith.constant 0 : i32
    return %c0_i32, %c0_i32_0 : i32, i32
  }
  func.func @transform_6(%arg0: i32, %arg1: i32) -> (i32, i32) {
    %c0_i32 = arith.constant 0 : i32
    %c0_i32_0 = arith.constant 0 : i32
    %c0_i32_1 = arith.constant 0 : i32
    return %c0_i32, %c0_i32_0 : i32, i32
  }
  func.func @transform_7(%arg0: i32, %arg1: i32) -> (i32, i32) {
    %c0_i32 = arith.constant 0 : i32
    %c0_i32_0 = arith.constant 0 : i32
    %c0_i32_1 = arith.constant 0 : i32
    return %c0_i32, %c0_i32_0 : i32, i32
  }
  func.func @transform_8(%arg0: i32, %arg1: i32) -> (i32, i32, i32, i32) {
    %c0_i32 = arith.constant 0 : i32
    %c0_i32_0 = arith.constant 0 : i32
    %c0_i32_1 = arith.constant 0 : i32
    return %arg0, %arg1, %c0_i32, %c0_i32_0 : i32, i32, i32, i32
  }
}

</mosaic_0001>

<bundles_post_ra>
// kernel: bottleneck_pallas.1
= control target key start
LH: loop header
LB: loop body
LE: loop exit
PB: predicated region body
PF: predicated region fallthrough
CT: control target
= control target key end

     0   :  { %s3581_s27 = smov 0   ;;  %s3583_s28 = smov 0   ;;  %s4793_s0 = inlined_call_operand.vmem [shape: bf16[2,16,16,128], index: 0, kind: input, shape index: {}]   ;;  %s4794_s1 = inlined_call_operand.vmem [shape: bf16[2,1,2,16,128], index: 1, kind: input, shape index: {}]   ;;  %s4795_s2 = inlined_call_operand.vmem [shape: bf16[128,32], index: 2, kind: input, shape index: {}]   ;;  %s4796_s3 = inlined_call_operand.vmem [shape: f32[1,32], index: 3, kind: input, shape index: {}]   ;;  %s4797_s4 = inlined_call_operand.vmem [shape: bf16[288,32], index: 4, kind: input, shape index: {}]   ;;  %s4798_s5 = inlined_call_operand.vmem [shape: f32[1,32], index: 5, kind: input, shape index: {}]   ;;  %s4799_s6 = inlined_call_operand.vmem [shape: bf16[32,128], index: 6, kind: input, shape index: {}]   ;;  %s4800_s7 = inlined_call_operand.vmem [shape: f32[1,128], index: 7, kind: input, shape index: {}]   ;;  %s4801_s8 = inlined_call_operand.vmem [shape: bf16[2,16,16,128], index: 8, kind: output, shape index: {}]  }
   0x1   :  { %s3585_s29 = smov 0  }
   0x2 LB: > { %s30_s30 = sadd.s32 1, %s3527_s28  ;;  %p2826_p0 = scmp.ge.s32.totalorder %s3531_s29, 1  ;;  %s3531_s29 = sphi %s3585_s29, %s18_s29   ;;  %s3527_s28 = sphi %s3583_s28, %s4825_s28   ;;  %s3523_s27 = sphi %s3581_s27, %s4824_s27  }
   0x3   : > { %p32_p1 = scmp.ge.s32.totalorder %s30_s30, 2  ;;  %p300_p2 = scmp.lt.s32.totalorder %s3531_s29, 3 }
   0x5   : > { %s4827_s30 = smov (%p32_p1, %s30_s30), 0  ;;  %p301_p3 = pnand %p2826_p0, %p300_p2 }
   0x7   : > { %304 = sbr.rel (%p301_p3) target bundleno = 984 (0x3d8), region = 52 }
   0xc   : > { %v3431_v0 = vld [vmem:[%s4795_s2 + $0x38] sm:$0xff]   ;;  %p354_p4 = scmp.lt.s32.totalorder %s3523_s27, 1  ;;  %v3432_v1 = vld [vmem:[%s4795_s2 + $0x30] sm:$0xff]   ;;  %v3433_v2 = vld [vmem:[%s4795_s2 + $0x28] sm:$0xff]   ;;  %v858_v28 = vlaneseq  ;;  %vm1425_vm3 = vcmask 261120   ;;  %s3533_s23 = smov 32  }
   0xd   : > { %3260 = vmatprep.subr.bf16.mxu0 %v3431_v0  ;;  %3308 = vmatprep.subr.bf16.mxu1 %v3431_v0  ;;  %v3434_v3 = vld [vmem:[%s4795_s2 + $0x20] sm:$0xff]   ;;  %v3435_v6 = vld [vmem:[%s4795_s2 + $0x18] sm:$0xff]   ;;  %v3436_v7 = vld [vmem:[%s4795_s2 + $0x10] sm:$0xff]   ;;  %s3534_s24 = smov 96   ;;  %s3535_s16 = smov 64   ;;  %vm1474_vm5 = vcmask 523264  }
   0xe   : > { %s4829_s27 = smov (!%p354_p4, %s3523_s27), 1  ;;  %3261 = vmatpush3.bf16.msra.mxu0 %v3431_v0  ;;  %3309 = vmatpush3.bf16.msra.mxu1 %v3431_v0  ;;  %v3437_v8 = vld [vmem:[%s4795_s2 + $0x8] sm:$0xff]   ;;  %v3438_v9 = vld [vmem:[%s4795_s2] sm:$0xff]   ;;  %v3459_v30 = vld [vmem:[%s4797_s4 + $0x78] sm:$0xff]   ;;  %v3682_v34 = vshrl.u32 %v858_v28, 7  ;;  %vm1507_vm6 = vcmask 785408  }
   0xf   : > { %3262 = vmatprep.subr.bf16.mxu0 %v3432_v1  ;;  %3310 = vmatprep.subr.bf16.mxu1 %v3432_v1  ;;  %s2948_s15 = sshll.u32 %s4829_s27, 7  ;;  %s2949_s19 = sshll.u32 %s4829_s27, 4  ;;  %v3660_v26 = vld [vmem:[%s4797_s4 + $0x88] sm:$0xff]   ;;  %v3667_v27 = vld [vmem:[%s4797_s4 + $0x80] sm:$0xff]   ;;  %v3460_v31 = vld [vmem:[%s4797_s4 + $0x38] sm:$0xff]  }
  0x10   : > { %s3616_s18 = scalar_lea.vmem %s4793_s0, %s2948_s15  ;;  %s3622_s22 = scalar_lea.vmem %s4794_s1, %s2949_s19  ;;  %v3674_v29 = vld [vmem:[%s4796_s3] ss:$0 sm:$0xff]  ;;  %v3461_v38 = vld [vmem:[%s4797_s4 + $0x70] sm:$0xff]   ;;  %v3694_v44 = vadd.s32 8, %v3682_v34  ;;  %vm901_vm0 = vcmp.lt.s32.totalorder %v3682_v34, 1  ;;  %v3463_v50 = vld [vmem:[%s4797_s4 + $0x68] sm:$0xff]  }
  0x11   : > { %v385_v4 = vld [vmem:[%s3616_s18] sm:$0xff]   ;;  %v387_v10 = vld [vmem:[%s3616_s18 + $0x8] sm:$0xff]   ;;  %v389_v11 = vld [vmem:[%s3616_s18 + $0x10] sm:$0xff]   ;;  %vm1050_vm1 = vcmp.lt.s32.totalorder %v3682_v34, 7  ;;  %vm861_vm4 = vcmp.eq.s32.totalorder %v3682_v34, 0  ;;  %s4724_s20 = scalar_lea.vmem %s4801_s8, %s2948_s15 }
  0x12   : > { %3263 = vmatpush3.bf16.msra.mxu0 %v3432_v1  ;;  %3311 = vmatpush3.bf16.msra.mxu1 %v3432_v1  ;;  %v3440_v5 = vld [vmem:[%s3622_s22] sm:$0xff]   ;;  %v3442_v12 = vld [vmem:[%s3622_s22 + $0x8] sm:$0xff]   ;;  %v391_v13 = vld [vmem:[%s3616_s18 + $0x18] sm:$0xff]   ;;  %vm864_vm2 = vcmp.eq.s32.totalorder %v3694_v44, 15 }
  0x13   : > { %3264 = vmatprep.subr.bf16.mxu0 %v3433_v2  ;;  %3312 = vmatprep.subr.bf16.mxu1 %v3433_v2  ;;  %v393_v14 = vld [vmem:[%s3616_s18 + $0x20] sm:$0xff]   ;;  %v395_v15 = vld [vmem:[%s3616_s18 + $0x28] sm:$0xff]   ;;  %v397_v16 = vld [vmem:[%s3616_s18 + $0x30] sm:$0xff]  }
  0x14   : > { %3276 = vmatprep.mubr.bf16.mxu0 %v385_v4  ;;  %3324 = vmatprep.mubr.bf16.mxu1 %v3440_v5  ;;  %v399_v17 = vld [vmem:[%s3616_s18 + $0x38] sm:$0xff]   ;;  %v401_v18 = vld [vmem:[%s3616_s18 + $0x40] sm:$0xff]   ;;  %v403_v19 = vld [vmem:[%s3616_s18 + $0x48] sm:$0xff]  }
  0x15   : > { %v405_v20 = vld [vmem:[%s3616_s18 + $0x50] sm:$0xff]   ;;  %v407_v21 = vld [vmem:[%s3616_s18 + $0x58] sm:$0xff]   ;;  %v409_v22 = vld [vmem:[%s3616_s18 + $0x60] sm:$0xff]  }
  0x16   : > { %3265 = vmatpush3.bf16.msra.mxu0 %v3433_v2  ;;  %3313 = vmatpush3.bf16.msra.mxu1 %v3433_v2  ;;  %v411_v23 = vld [vmem:[%s3616_s18 + $0x68] sm:$0xff]   ;;  %v413_v24 = vld [vmem:[%s3616_s18 + $0x70] sm:$0xff]   ;;  %v415_v25 = vld [vmem:[%s3616_s18 + $0x78] sm:$0xff]  }
  0x17   : > { %3266 = vmatprep.subr.bf16.mxu0 %v3434_v3  ;;  %3314 = vmatprep.subr.bf16.mxu1 %v3434_v3  ;;  %v3462_v39 = vld [vmem:[%s4797_s4 + $0x30] sm:$0xff]   ;;  %v3464_v51 = vld [vmem:[%s4797_s4 + $0x28] sm:$0xff]   ;;  %v3465_v2 = vld [vmem:[%s4797_s4 + $0x60] sm:$0xff]  }
  0x1a   : > { %3267 = vmatpush3.bf16.msra.mxu0 %v3434_v3  ;;  %3315 = vmatpush3.bf16.msra.mxu1 %v3434_v3  ;;  %v3466_v3 = vld [vmem:[%s4797_s4 + $0x20] sm:$0xff]  }
  0x1b   : > { %3268 = vmatprep.subr.bf16.mxu0 %v3435_v6  ;;  %3316 = vmatprep.subr.bf16.mxu1 %v3435_v6 }
  0x1e   : > { %3269 = vmatpush3.bf16.msra.mxu0 %v3435_v6  ;;  %3317 = vmatpush3.bf16.msra.mxu1 %v3435_v6 }
  0x1f   : > { %3270 = vmatprep.subr.bf16.mxu0 %v3436_v7  ;;  %3318 = vmatprep.subr.bf16.mxu1 %v3436_v7 }
  0x22   : > { %3271 = vmatpush3.bf16.msra.mxu0 %v3436_v7  ;;  %3319 = vmatpush3.bf16.msra.mxu1 %v3436_v7 }
  0x23   : > { %3272 = vmatprep.subr.bf16.mxu0 %v3437_v8  ;;  %3320 = vmatprep.subr.bf16.mxu1 %v3437_v8 }
  0x26   : > { %3273 = vmatpush3.bf16.msra.mxu0 %v3437_v8  ;;  %3321 = vmatpush3.bf16.msra.mxu1 %v3437_v8 }
  0x27   : > { %3274 = vmatprep.subr.bf16.mxu0 %v3438_v9  ;;  %3322 = vmatprep.subr.bf16.mxu1 %v3438_v9 }
  0x2a   : > { %3275 = vmatpush3.bf16.msra.mxu0 %v3438_v9  ;;  %3323 = vmatpush3.bf16.msra.mxu1 %v3438_v9 }
  0x2b   : > { %3328 = vmatprep.subr.bf16.mxu0 %v3660_v26  ;;  %3112 = vmatprep.subr.bf16.mxu1 %v3459_v30 }
  0x2d   : > { %3277 = vmatmul.mubr.bf16.vlgmr.msra.gmra.mxu0 %v387_v10  ;;  %3325 = vmatmul.mubr.bf16.vlgmr.msra.gmra.mxu1 %v3442_v12 }
  0x2e   : > { %3280 = vmatprep.mubr.bf16.mxu0 %v389_v11  ;;  %3329 = vmatpush3.bf16.msra.mxu0 %v3660_v26 }
  0x2f   : > { %3330 = vmatprep.subr.bf16.mxu0 %v3667_v27  ;;  %3113 = vmatpush3.bf16.msra.mxu1 %v3460_v31  ;;  %v3468_v31 = vld [vmem:[%s4797_s4 + $0x18] sm:$0xff]  }
  0x30   : > { %3114 = vmatprep.subr.bf16.mxu1 %v3461_v38 }
  0x32   : > { %3331 = vmatpush3.bf16.msra.mxu0 %v3667_v27 }
  0x33   : > { %3115 = vmatpush3.bf16.msra.mxu1 %v3462_v39 }
  0x34   : > { %3116 = vmatprep.subr.bf16.mxu1 %v3463_v50 }
  0x35   : > { %3281 = vmatmul.mubr.bf16.gmra.mxu0 %v391_v13 }
  0x36   : > { %3284 = vmatprep.mubr.bf16.mxu0 %v393_v14 }
  0x37   : > { %3117 = vmatpush3.bf16.msra.mxu1 %v3464_v51 }
  0x38   : > { %3118 = vmatprep.subr.bf16.mxu1 %v3465_v2 }
  0x3b   : > { %3119 = vmatpush3.bf16.msra.mxu1 %v3466_v3 }
  0x3d   : > { %3285 = vmatmul.mubr.bf16.gmra.mxu0 %v395_v15 }
  0x3e   : > { %3288 = vmatprep.mubr.bf16.mxu0 %v397_v16 }
  0x45   : > { %3289 = vmatmul.mubr.bf16.gmra.mxu0 %v399_v17 }
  0x46   : > { %3292 = vmatprep.mubr.bf16.mxu0 %v401_v18 }
  0x4d   : > { %3293 = vmatmul.mubr.bf16.gmra.mxu0 %v403_v19 }
  0x4e   : > { %3296 = vmatprep.mubr.bf16.mxu0 %v405_v20 }
  0x55   : > { %3297 = vmatmul.mubr.bf16.gmra.mxu0 %v407_v21 }
  0x56   : > { %3300 = vmatprep.mubr.bf16.mxu0 %v409_v22  ;;  %v3467_v22 = vld [vmem:[%s4797_s4 + $0x58] sm:$0xff]  }
  0x57   : > { %3120 = vmatprep.subr.bf16.mxu1 %v3467_v22 }
  0x58   : > { %3121 = vmatpush3.bf16.msra.mxu1 %v3468_v31 }
  0x5d   : > { %3301 = vmatmul.mubr.bf16.gmra.mxu0 %v411_v23 }
  0x5e   : > { %3304 = vmatprep.mubr.bf16.mxu0 %v413_v24 }
  0x65   : > { %3305 = vmatmul.mubr.bf16.gmra.mxu0 %v415_v25 }
  0xed   : > { %v3278_v32 = vpop.f32.mrf.mxu0  ;;  %v3326_v33 = vpop.f32.mrf.mxu1 }
  0xee   : > { %v631_v35 = vadd.f32 %v3278_v32, %v3674_v29  ;;  %v3700_v49 = vadd.f32 %v3326_v33, %v3674_v29 }
  0xef   : > { %v622_v36 = vpop.f32.mrf.mxu0  ;;  %v827_v37 = vpop.f32.mrf.mxu1 }
  0xf0   : > { %v828_v40 = vadd.f32 %v3674_v29, %v827_v37  ;;  %v623_v43 = vadd.f32 %v3674_v29, %v622_v36  ;;  %v3696_v45 = vmax.f32 %v631_v35, 0.0 }
  0xf1   : > { %v3279_v41 = vpop.f32.mrf.mxu0  ;;  %v3327_v42 = vpop.f32.mrf.mxu1 }
  0xf2   : > { %v634_v46 = vadd.f32 %v3279_v41, %v3674_v29  ;;  %v842_v52 = vmax.f32 %v828_v40, 0.0  ;;  %v3711_v56 = vmax.f32 %v623_v43, 0.0  ;;  %v1016_v59 = vrot.slane %v3696_v45, 1 }
  0xf3   : > { %v625_v47 = vpop.f32.mrf.mxu0  ;;  %v830_v48 = vpop.f32.mrf.mxu1  ;;  %v3720_v63 = vadd.f32 %v3327_v42, %v3674_v29  ;;  %v867_v9 = vrot.slane %v3696_v45, 7 }
  0xf4   : > { %v752_v53 = vmax.f32 %v634_v46, 0.0  ;;  %v626_v54 = vadd.f32 %v3674_v29, %v625_v47  ;;  %v831_v57 = vadd.f32 %v3674_v29, %v830_v48  ;;  %v3730_v4 = vmul.f32 0.0, %v842_v52  ;;  %v3469_v47 = vld [vmem:[%s4797_s4 + $0x50] sm:$0xff]  }
  0xf5   : > { %v3282_v55 = vpop.f32.mrf.mxu0  ;;  %v866_v10 = vrot.slane %v3711_v56, 7  ;;  %v1015_v18 = vrot.slane %v3711_v56, 1  ;;  %3122 = vmatprep.subr.bf16.mxu1 %v3469_v47 }
  0xf6   : > { %v647_v58 = vadd.f32 %v3282_v55, %v3674_v29  ;;  %v1034_v60 = vrot.slane %v752_v53, 1  ;;  %v3722_v0 = vmax.f32 %v626_v54, 0.0  ;;  %v843_v1 = vmax.f32 %v831_v57, 0.0  ;;  %v3470_v54 = vld [vmem:[%s4797_s4 + $0x10] sm:$0xff]  }
  0xf7   : > { %v638_v61 = vpop.f32.mrf.mxu0  ;;  %v3734_v6 = vpack.c.bf16 %v752_v53, %v3696_v45  ;;  %v885_v11 = vrot.slane %v752_v53, 7  ;;  %3123 = vmatpush3.bf16.msra.mxu1 %v3470_v54 }
  0xf8   : > { %v639_v5 = vadd.f32 %v3674_v29, %v638_v61  ;;  %v1071_v8 = vsel %vm1050_vm1, %v1034_v60, %v1016_v59  ;;  %v3740_v12 = vmax.f32 %v647_v58, 0.0  ;;  %v1033_v13 = vrot.slane %v3722_v0, 1 }
  0xf9   : > { %v3283_v7 = vpop.f32.mrf.mxu0  ;;  %v3743_v14 = vmul.f32 0.0, %v843_v1  ;;  %1201 = vrot.lane.b32.xlu1 %v3734_v6, %s3533_s23  ;;  %1393 = vrot.lane.b32.xlu0 %v3734_v6, %s3534_s24  ;;  %v1053_v17 = vsel %vm1050_vm1, %v1016_v59, %v1034_v60  ;;  %v1096_v21 = vsel %vm864_vm2, 0.0, %v1071_v8  ;;  %v3766_v28 = vpack.c.bf16 %v3722_v0, %v3711_v56 }
  0xfa   : > { %v3745_v15 = vmax.f32 %v639_v5, 0.0  ;;  %v650_v19 = vadd.f32 %v3283_v7, %v3674_v29  ;;  %v3775_v35 = vpack.c.bf16 %v1096_v21, %v1053_v17  ;;  %v1018_v37 = vrot.slane %v3740_v12, 1 }
  0xfb   : > { %v641_v16 = vpop.f32.mrf.mxu0  ;;  %v996_v36 = vpack.c.bf16 %v3743_v14, %v3730_v4  ;;  %v904_v38 = vsel %vm901_vm0, %v867_v9, %v885_v11  ;;  %v922_v39 = vsel %vm901_vm0, %v885_v11, %v867_v9  ;;  %v1070_v40 = vsel %vm1050_vm1, %v1033_v13, %v1015_v18  ;;  %v3471_v9 = vld [vmem:[%s4797_s4 + $0x48] sm:$0xff]  }
  0xfc   : > { %v642_v20 = vadd.f32 %v3674_v29, %v641_v16  ;;  %v1017_v25 = vrot.slane %v3745_v15, 1  ;;  %v3771_v32 = vmax.f32 %v650_v19, 0.0  ;;  %v884_v42 = vrot.slane %v3722_v0, 7  ;;  %3332 = vmatprep.mubr.msk.bf16.mxu0 %vm1425_vm3, %v3775_v35  ;;  %v3472_v19 = vld [vmem:[%s4797_s4 + $0x8] sm:$0xff]   ;;  %3124 = vmatprep.subr.bf16.mxu1 %v3471_v9 }
  0xfd   : > { %v3286_v30 = vpop.f32.mrf.mxu0  ;;  %1199 = vrot.lane.b32.xlu1 %v3766_v28, %s3533_s23  ;;  %v869_v43 = vrot.slane %v3740_v12, 7  ;;  %1197 = vrot.lane.b32.xlu0 %v996_v36, %s3533_s23  ;;  %v946_v50 = vsel %vm861_vm4, 0.0, %v922_v39  ;;  %v1052_v51 = vsel %vm1050_vm1, %v1015_v18, %v1033_v13  ;;  %v1094_v59 = vsel %vm864_vm2, 0.0, %v1070_v40 }
  0xfe   : > { %v3773_v33 = vmax.f32 %v642_v20, 0.0  ;;  %v1036_v45 = vrot.slane %v3771_v32, 1  ;;  %v887_v48 = vrot.slane %v3771_v32, 7  ;;  %v663_v52 = vadd.f32 %v3286_v30, %v3674_v29  ;;  %3125 = vmatpush3.bf16.msra.mxu1 %v3472_v19 }
  0xff   : > { %v654_v41 = vpop.f32.mrf.mxu0  ;;  %v3811_v58 = vpack.c.bf16 %v904_v38, %v946_v50  ;;  %v1014_v11 = vrot.slane %v3730_v4, 1  ;;  %v1032_v16 = vrot.slane %v3743_v14, 1  ;;  %v3844_v20 = vpack.c.bf16 %v1094_v59, %v1052_v51  ;;  %v3474_v51 = vld [vmem:[%s4797_s4] sm:$0xff]  }
 0x100   : > { %v1035_v46 = vrot.slane %v3773_v33, 1  ;;  %v1055_v61 = vsel %vm1050_vm1, %v1018_v37, %v1036_v45  ;;  %v1073_v0 = vsel %vm1050_vm1, %v1036_v45, %v1018_v37  ;;  %v3821_v1 = vmax.f32 %v663_v52, 0.0 }
 0x101   : > { %v3287_v53 = vpop.f32.mrf.mxu0  ;;  %4807 = vst [vmem:[#allocation2_spill] sm:$0xff] %v3811_v58  ;;  %1328 = vrot.lane.b32.xlu0 %v3775_v35, %s3533_s23  ;;  %1359 = vrot.lane.b32.xlu1 %v3811_v58, %s3535_s16  ;;  %v1100_v5 = vsel %vm864_vm2, 0.0, %v1073_v0  ;;  %v655_v7 = vadd.f32 %v3674_v29, %v654_v41  ;;  %v868_v30 = vrot.slane %v3745_v15, 7  ;;  %v886_v31 = vrot.slane %v3773_v33, 7 }
 0x102   : > { %v1054_v55 = vsel %vm1050_vm1, %v1017_v25, %v1035_v46  ;;  %v1072_v57 = vsel %vm1050_vm1, %v1035_v46, %v1017_v25  ;;  %v666_v8 = vadd.f32 %v3287_v53, %v3674_v29  ;;  %v3839_v17 = vpack.c.bf16 %v1100_v5, %v1055_v61  ;;  %v3473_v46 = vld [vmem:[%s4797_s4 + $0x40] sm:$0xff]  }
 0x103   : > { %v1098_v60 = vsel %vm864_vm2, 0.0, %v1072_v57  ;;  %v657_v2 = vpop.f32.mrf.mxu0  ;;  %v3848_v21 = vmax.f32 %v655_v7, 0.0  ;;  %v921_v25 = vsel %vm901_vm0, %v884_v42, %v866_v10  ;;  %v1020_v36 = vrot.slane %v3821_v1, 1  ;;  %3126 = vmatprep.subr.bf16.mxu1 %v3473_v46 }
 0x104   : > { %v3823_v3 = vpack.c.bf16 %v1098_v60, %v1054_v55  ;;  %v3850_v22 = vmax.f32 %v666_v8, 0.0  ;;  %v658_v37 = vadd.f32 %v3674_v29, %v657_v2  ;;  %v903_v40 = vsel %vm901_vm0, %v866_v10, %v884_v42  ;;  %3127 = vmatpush3.bf16.msra.mxu1 %v3474_v51 }
 0x105   : > { %v3290_v18 = vpop.f32.mrf.mxu0  ;;  %1326 = vrot.lane.b32.xlu0 %v3844_v20, %s3533_s23  ;;  %1295 = vrot.lane.b32.xlu1 %v3811_v58, %s3534_s24  ;;  %v944_v41 = vsel %vm861_vm4, 0.0, %v921_v25  ;;  %v924_v45 = vsel %vm901_vm0, %v887_v48, %v869_v43  ;;  %v871_v47 = vrot.slane %v3821_v1, 7  ;;  %v3883_v56 = vpack.c.bf16 %v3771_v32, %v3740_v12 }
 0x106   : > { %3333 = vmatmul.mubr.msk.bf16.vlgmr.msra.gmra.mxu0 %vm1425_vm3, %v3823_v3  ;;  %v1038_v39 = vrot.slane %v3850_v22, 1  ;;  %v1019_v10 = vrot.slane %v3848_v21, 1  ;;  %v3886_v42 = vmax.f32 %v658_v37, 0.0  ;;  %v889_v52 = vrot.slane %v3850_v22, 7  ;;  %3400 = vmatprep.subr.bf16.mxu1 %v3660_v26 }
 0x107   : > { %3336 = vmatprep.mubr.msk.bf16.mxu0 %vm1425_vm3, %v3839_v17  ;;  %v670_v38 = vpop.f32.mrf.mxu0  ;;  %4808 = vst [vmem:[#allocation3_spill] sm:$0xff] %v3883_v56  ;;  %v3894_v53 = vpack.c.bf16 %v3773_v33, %v3745_v15  ;;  %v906_v32 = vsel %vm901_vm0, %v869_v43, %v887_v48  ;;  %v1069_v54 = vsel %vm1050_vm1, %v1032_v16, %v1014_v11  ;;  %v950_v59 = vsel %vm861_vm4, 0.0, %v924_v45 }
 0x108   : > { %v3902_v55 = vpack.c.bf16 %v903_v40, %v944_v41  ;;  %v1037_v57 = vrot.slane %v3886_v42, 1  ;;  %v923_v15 = vsel %vm901_vm0, %v886_v31, %v868_v30  ;;  %v3915_v12 = vsel %vm1050_vm1, %v1014_v11, %v1032_v16 }
 0x109   : > { %v3291_v50 = vpop.f32.mrf.mxu0  ;;  %4809 = vst [vmem:[#allocation4_spill] sm:$0xff] %v3894_v53  ;;  %1397 = vrot.lane.b32.xlu0 %v3883_v56, %s3534_s24  ;;  %1249 = vrot.lane.b32.xlu1 %v3775_v35, %s3535_s16  ;;  %v1092_v43 = vsel %vm864_vm2, 0.0, %v1069_v54  ;;  %v905_v48 = vsel %vm901_vm0, %v868_v30, %v886_v31  ;;  %v1057_v60 = vsel %vm1050_vm1, %v1020_v36, %v1038_v39  ;;  %v948_v7 = vsel %vm861_vm4, 0.0, %v923_v15 }
 0x10a   : > { %v1056_v61 = vsel %vm1050_vm1, %v1019_v10, %v1037_v57  ;;  %v1074_v0 = vsel %vm1050_vm1, %v1037_v57, %v1019_v10  ;;  %v1075_v35 = vsel %vm1050_vm1, %v1038_v39, %v1020_v36  ;;  %v679_v2 = vadd.f32 %v3290_v18, %v3674_v29 }
 0x10b   : > { %v673_v33 = vpop.f32.mrf.mxu0  ;;  %v1102_v8 = vsel %vm864_vm2, 0.0, %v1074_v0  ;;  %v1104_v9 = vsel %vm864_vm2, 0.0, %v1075_v35  ;;  %v671_v11 = vadd.f32 %v3674_v29, %v670_v38  ;;  %v682_v25 = vadd.f32 %v3291_v50, %v3674_v29 }
 0x10c   : > { %v3938_v16 = vpack.c.bf16 %v1102_v8, %v1056_v61  ;;  %v3940_v19 = vpack.c.bf16 %v1104_v9, %v1057_v60  ;;  %v3942_v18 = vmax.f32 %v679_v2, 0.0  ;;  %v870_v31 = vrot.slane %v3848_v21, 7 }
 0x10d   : > { %v3294_v5 = vpop.f32.mrf.mxu0  ;;  %1395 = vrot.lane.b32.xlu0 %v3894_v53, %s3534_s24  ;;  %1293 = vrot.lane.b32.xlu1 %v3902_v55, %s3534_s24  ;;  %v3950_v36 = vpack.c.bf16 %v906_v32, %v950_v59  ;;  %v3952_v37 = vmax.f32 %v671_v11, 0.0  ;;  %v674_v38 = vadd.f32 %v3674_v29, %v673_v33  ;;  %v888_v39 = vrot.slane %v3886_v42, 7 }
 0x10e   : > { %v1127_v40 = vpack.c.bf16 %v1092_v43, %v3915_v12  ;;  %3337 = vmatmul.mubr.msk.bf16.gmra.mxu0 %vm1425_vm3, %v3938_v16  ;;  %v1022_v41 = vrot.slane %v3942_v18, 1  ;;  %v3960_v45 = vmax.f32 %v682_v25, 0.0  ;;  %v3962_v10 = vpack.c.bf16 %v905_v48, %v948_v7 }
 0x10f   : > { %v686_v30 = vpop.f32.mrf.mxu0  ;;  %4810 = vst [vmem:[#allocation5_spill] sm:$0xff] %v3950_v36  ;;  %3340 = vmatprep.mubr.msk.bf16.mxu0 %vm1425_vm3, %v3940_v19  ;;  %v3968_v50 = vpack.c.bf16 %v3850_v22, %v3821_v1  ;;  %v1021_v51 = vrot.slane %v3952_v37, 1  ;;  %v3971_v32 = vmax.f32 %v674_v38, 0.0  ;;  %v873_v54 = vrot.slane %v3942_v18, 7 }
 0x110   : > { %4811 = vst [vmem:[#allocation6_spill] sm:$0xff] %v3962_v10  ;;  %v1040_v57 = vrot.slane %v3960_v45, 1  ;;  %v3977_v59 = vpack.c.bf16 %v3886_v42, %v3848_v21  ;;  %v3983_v15 = vsel %vm901_vm0, %v871_v47, %v889_v52  ;;  %v872_v33 = vrot.slane %v3952_v37, 7 }
 0x111   : > { %v3295_v46 = vpop.f32.mrf.mxu0  ;;  %1363 = vrot.lane.b32.xlu0 %v3950_v36, %s3535_s16  ;;  %1247 = vrot.lane.b32.xlu1 %v3844_v20, %s3535_s16  ;;  %v1039_v12 = vrot.slane %v3971_v32, 1  ;;  %v926_v21 = vsel %vm901_vm0, %v889_v52, %v871_v47  ;;  %v695_v42 = vadd.f32 %v3294_v5, %v3674_v29  ;;  %v891_v43 = vrot.slane %v3960_v45, 7 }
 0x112   : > { %v890_v48 = vrot.slane %v3971_v32, 7  ;;  %v1059_v60 = vsel %vm1050_vm1, %v1022_v41, %v1040_v57  ;;  %v1077_v20 = vsel %vm1050_vm1, %v1040_v57, %v1022_v41  ;;  %v925_v0 = vsel %vm901_vm0, %v888_v39, %v870_v31 }
 0x113   : > { %v689_v22 = vpop.f32.mrf.mxu0  ;;  %v1058_v1 = vsel %vm1050_vm1, %v1021_v51, %v1039_v12  ;;  %v1076_v47 = vsel %vm1050_vm1, %v1039_v12, %v1021_v51  ;;  %v1108_v52 = vsel %vm864_vm2, 0.0, %v1077_v20  ;;  %v4014_v5 = vmax.f32 %v695_v42, 0.0 }
 0x114   : > { %v1106_v35 = vsel %vm864_vm2, 0.0, %v1076_v47  ;;  %v4012_v2 = vpack.c.bf16 %v1108_v52, %v1059_v60  ;;  %v687_v7 = vadd.f32 %v3674_v29, %v686_v30  ;;  %v954_v9 = vsel %vm861_vm4, 0.0, %v926_v21 }
 0x115   : > { %v3298_v61 = vpop.f32.mrf.mxu0  ;;  %1332 = vrot.lane.b32.xlu0 %v3839_v17, %s3533_s23  ;;  %1245 = vrot.lane.b32.xlu1 %v1127_v40, %s3535_s16  ;;  %v907_v11 = vsel %vm901_vm0, %v870_v31, %v888_v39  ;;  %v4024_v25 = vpack.c.bf16 %v1106_v35, %v1058_v1  ;;  %v698_v38 = vadd.f32 %v3295_v46, %v3674_v29  ;;  %v952_v41 = vsel %vm861_vm4, 0.0, %v925_v0 }
 0x116   : > { %v875_v30 = vrot.slane %v4014_v5, 7  ;;  %v4030_v51 = vmax.f32 %v687_v7, 0.0  ;;  %v690_v57 = vadd.f32 %v3674_v29, %v689_v22  ;;  %v1024_v12 = vrot.slane %v4014_v5, 1 }
 0x117   : > { %v702_v8 = vpop.f32.mrf.mxu0  ;;  %3341 = vmatmul.mubr.msk.bf16.gmra.mxu0 %vm1425_vm3, %v4024_v25  ;;  %v4036_v31 = vmax.f32 %v698_v38, 0.0  ;;  %v910_v39 = vsel %vm901_vm0, %v873_v54, %v891_v43  ;;  %v928_v46 = vsel %vm901_vm0, %v891_v43, %v873_v54  ;;  %v909_v60 = vsel %vm901_vm0, %v872_v33, %v890_v48 }
 0x118   : > { %3344 = vmatprep.mubr.msk.bf16.mxu0 %vm1425_vm3, %v4012_v2  ;;  %v1023_v21 = vrot.slane %v4030_v51, 1  ;;  %v4045_v22 = vmax.f32 %v690_v57, 0.0  ;;  %v958_v42 = vsel %vm861_vm4, 0.0, %v928_v46  ;;  %v874_v54 = vrot.slane %v4030_v51, 7 }
 0x119   : > { %v3299_v40 = vpop.f32.mrf.mxu0  ;;  %1361 = vrot.lane.b32.xlu0 %v3962_v10, %s3535_s16  ;;  %1205 = vrot.lane.b32.xlu1 %v3883_v56, %s3533_s23  ;;  %v1042_v43 = vrot.slane %v4036_v31, 1  ;;  %v4057_v0 = vpack.c.bf16 %v910_v39, %v958_v42  ;;  %v927_v1 = vsel %vm901_vm0, %v890_v48, %v872_v33  ;;  %v893_v47 = vrot.slane %v4036_v31, 7 }
 0x11a   : > { %v1041_v52 = vrot.slane %v4045_v22, 1  ;;  %v956_v35 = vsel %vm861_vm4, 0.0, %v927_v1  ;;  %v711_v7 = vadd.f32 %v3298_v61, %v3674_v29  ;;  %v892_v57 = vrot.slane %v4045_v22, 7 }
 0x11b   : > { %v705_v20 = vpop.f32.mrf.mxu0  ;;  %v4067_v46 = vpack.c.bf16 %v909_v60, %v956_v35  ;;  %v1061_v39 = vsel %vm1050_vm1, %v1024_v12, %v1042_v43  ;;  %v1079_v33 = vsel %vm1050_vm1, %v1042_v43, %v1024_v12  ;;  %v4086_v12 = vpack.c.bf16 %v3983_v15, %v954_v9 }
 0x11c   : > { %v1060_v48 = vsel %vm1050_vm1, %v1023_v21, %v1041_v52  ;;  %v1078_v42 = vsel %vm1050_vm1, %v1041_v52, %v1023_v21  ;;  %v1112_v61 = vsel %vm864_vm2, 0.0, %v1079_v33  ;;  %v4079_v1 = vmax.f32 %v711_v7, 0.0 }
 0x11d   : > { %v3302_v38 = vpop.f32.mrf.mxu0  ;;  %1330 = vrot.lane.b32.xlu0 %v3823_v3, %s3533_s23  ;;  %1203 = vrot.lane.b32.xlu1 %v3894_v53, %s3533_s23  ;;  %v1110_v60 = vsel %vm864_vm2, 0.0, %v1078_v42  ;;  %v703_v21 = vadd.f32 %v3674_v29, %v702_v8  ;;  %v714_v43 = vadd.f32 %v3299_v40, %v3674_v29  ;;  %v4092_v52 = vpack.c.bf16 %v907_v11, %v952_v41 }
 0x11e   : > { %v4094_v35 = vpack.c.bf16 %v1110_v60, %v1060_v48  ;;  %v4096_v7 = vpack.c.bf16 %v1112_v61, %v1061_v39  ;;  %v1026_v33 = vrot.slane %v4079_v1, 1  ;;  %v706_v9 = vadd.f32 %v3674_v29, %v705_v20 }
 0x11f   : > { %v718_v62 = vpop.f32.mrf.mxu0  ;;  %v4099_v23 = vmax.f32 %v703_v21, 0.0  ;;  %v772_v15 = vmax.f32 %v714_v43, 0.0  ;;  %v912_v42 = vsel %vm901_vm0, %v875_v30, %v893_v47  ;;  %v930_v8 = vsel %vm901_vm0, %v893_v47, %v875_v30 }
 0x120   : > { %3345 = vmatmul.mubr.msk.bf16.gmra.mxu0 %vm1425_vm3, %v4094_v35  ;;  %v911_v11 = vsel %vm901_vm0, %v874_v54, %v892_v57  ;;  %v929_v41 = vsel %vm901_vm0, %v892_v57, %v874_v54  ;;  %v727_v40 = vadd.f32 %v3302_v38, %v3674_v29  ;;  %v877_v20 = vrot.slane %v4079_v1, 7 }
 0x121   : > { %v3303_v24 = vpop.f32.mrf.mxu0  ;;  %1401 = vrot.lane.b32.xlu0 %v3968_v50, %s3534_s24  ;;  %1299 = vrot.lane.b32.xlu1 %v3950_v36, %s3534_s24  ;;  %v876_v48 = vrot.slane %v4099_v23, 7  ;;  %v1025_v30 = vrot.slane %v4099_v23, 1  ;;  %v1044_v47 = vrot.slane %v772_v15, 1  ;;  %v770_v54 = vmax.f32 %v706_v9, 0.0 }
 0x122   : > { %3348 = vmatprep.mubr.msk.bf16.mxu0 %vm1425_vm3, %v4096_v7  ;;  %v962_v38 = vsel %vm861_vm4, 0.0, %v930_v8  ;;  %v960_v57 = vsel %vm861_vm4, 0.0, %v929_v41  ;;  %v4126_v61 = vmax.f32 %v727_v40, 0.0  ;;  %v895_v9 = vrot.slane %v772_v15, 7 }
 0x123   : > { %v721_v39 = vpop.f32.mrf.mxu0  ;;  %v4128_v21 = vpack.c.bf16 %v912_v42, %v962_v38  ;;  %v4130_v43 = vpack.c.bf16 %v911_v11, %v960_v57  ;;  %v1063_v13 = vsel %vm1050_vm1, %v1026_v33, %v1044_v47  ;;  %v1081_v36 = vsel %vm1050_vm1, %v1044_v47, %v1026_v33 }
 0x124   : > { %v894_v56 = vrot.slane %v770_v54, 7  ;;  %v1043_v58 = vrot.slane %v770_v54, 1  ;;  %v1116_v8 = vsel %vm864_vm2, 0.0, %v1081_v36  ;;  %v879_v11 = vrot.slane %v4126_v61, 7 }
 0x125   : > { %v3306_v60 = vpop.f32.mrf.mxu0  ;;  %1399 = vrot.lane.b32.xlu0 %v3977_v59, %s3534_s24  ;;  %1253 = vrot.lane.b32.xlu1 %v3839_v17, %s3535_s16  ;;  %v4142_v42 = vpack.c.bf16 %v1116_v8, %v1063_v13  ;;  %v4146_v41 = vpack.c.bf16 %v772_v15, %v4079_v1  ;;  %v719_v33 = vadd.f32 %v3674_v29, %v718_v62  ;;  %v4812_v1 = vrot.slane %v3743_v14, 7 }
 0x126   : > { %v1062_v40 = vsel %vm1050_vm1, %v1025_v30, %v1043_v58  ;;  %v1080_v36 = vsel %vm1050_vm1, %v1043_v58, %v1025_v30  ;;  %v730_v47 = vadd.f32 %v3303_v24, %v3674_v29  ;;  %v4155_v38 = vpack.c.bf16 %v770_v54, %v4099_v23 }
 0x127   : > { %v734_v13 = vpop.f32.mrf.mxu0  ;;  %v1114_v17 = vsel %vm864_vm2, 0.0, %v1080_v36  ;;  %v4159_v57 = vmax.f32 %v719_v33, 0.0  ;;  %v4813_v62 = vrot.slane %v3730_v4, 7  ;;  %v4815_v24 = vmov %v4812_v1 }
 0x128   : > { %v4175_v30 = vpack.c.bf16 %v1114_v17, %v1062_v40  ;;  %v776_v54 = vmax.f32 %v730_v47, 0.0  ;;  %v722_v33 = vadd.f32 %v3674_v29, %v721_v39  ;;  %v1028_v4 = vrot.slane %v4126_v61, 1 }
 0x129   : > { %v4167_v15 = vsel %vm901_vm0, %v4813_v62, %v4812_v1  ;;  %v4814_v58 = vmov %v4813_v62  ;;  %1367 = vrot.lane.b32.xlu0 %v4086_v12, %s3535_s16  ;;  %1297 = vrot.lane.b32.xlu1 %v3962_v10, %s3534_s24  ;;  %v878_v14 = vrot.slane %v4159_v57, 7  ;;  %v914_v36 = vsel %vm901_vm0, %v877_v20, %v895_v9  ;;  %v3307_v62 = vpop.f32.mrf.mxu0 }
 0x12a   : > { %v920_v23 = vsel %vm901_vm0, %v4815_v24, %v4814_v58  ;;  %3349 = vmatmul.mubr.msk.bf16.gmra.mxu0 %vm1425_vm3, %v4175_v30  ;;  %v1027_v39 = vrot.slane %v4159_v57, 1  ;;  %v897_v47 = vrot.slane %v776_v54, 7  ;;  %v774_v17 = vmax.f32 %v722_v33, 0.0 }
 0x12b   : > { %v4179_v8 = vsel %vm861_vm4, 0.0, %v920_v23  ;;  %v932_v1 = vsel %vm901_vm0, %v895_v9, %v877_v20  ;;  %3352 = vmatprep.mubr.msk.bf16.mxu0 %vm1425_vm3, %v4142_v42  ;;  %v913_v24 = vsel %vm901_vm0, %v876_v48, %v894_v56  ;;  %v931_v23 = vsel %vm901_vm0, %v894_v56, %v876_v48 }
 0x12c   : > { %v966_v58 = vsel %vm861_vm4, 0.0, %v932_v1  ;;  %v4206_v40 = vpack.c.bf16 %v776_v54, %v4126_v61  ;;  %v1046_v33 = vrot.slane %v776_v54, 1  ;;  %v1045_v10 = vrot.slane %v774_v17, 1 }
 0x12d   : > { %v4208_v53 = vpack.c.bf16 %v914_v36, %v966_v58  ;;  %v964_v20 = vsel %vm861_vm4, 0.0, %v931_v23  ;;  %1336 = vrot.lane.b32.xlu0 %v3940_v19, %s3533_s23  ;;  %1251 = vrot.lane.b32.xlu1 %v3823_v3, %s3535_s16  ;;  %v896_v9 = vrot.slane %v774_v17, 7  ;;  %v743_v56 = vadd.f32 %v3306_v60, %v3674_v29  ;;  %v737_v23 = vpop.f32.mrf.mxu0 }
 0x12e   : > { %v4216_v1 = vpack.c.bf16 %v913_v24, %v964_v20  ;;  %v4220_v48 = vpack.c.bf16 %v774_v17, %v4159_v57  ;;  %v1064_v61 = vsel %vm1050_vm1, %v1027_v39, %v1045_v10  ;;  %v1082_v54 = vsel %vm1050_vm1, %v1045_v10, %v1027_v39 }
 0x12f   : > { %v735_v36 = vadd.f32 %v3674_v29, %v734_v13  ;;  %v746_v58 = vadd.f32 %v3307_v62, %v3674_v29  ;;  %v1118_v3 = vsel %vm864_vm2, 0.0, %v1082_v54  ;;  %v4230_v24 = vmax.f32 %v743_v56, 0.0 }
 0x130   : > { %v916_v60 = vsel %vm901_vm0, %v879_v11, %v897_v47  ;;  %v934_v57 = vsel %vm901_vm0, %v897_v47, %v879_v11  ;;  %v4236_v17 = vpack.c.bf16 %v1118_v3, %v1064_v61  ;;  %v4816_v39 = vmax.f32 %v3720_v63, 0.0 }
 0x131   : > { %v4238_v20 = vmax.f32 %v735_v36, 0.0  ;;  %v4240_v10 = vmax.f32 %v746_v58, 0.0  ;;  %v970_v13 = vsel %vm861_vm4, 0.0, %v934_v57  ;;  %1365 = vrot.lane.b32.xlu0 %v4092_v52, %s3535_s16  ;;  %1209 = vrot.lane.b32.xlu1 %v3968_v50, %s3533_s23  ;;  %v881_v11 = vrot.slane %v4230_v24, 7 }
 0x132   : > { %v4246_v62 = vmul.f32 0.0, %v4816_v39  ;;  %v4253_v47 = vpack.c.bf16 %v916_v60, %v970_v13  ;;  %v738_v56 = vadd.f32 %v3674_v29, %v737_v23  ;;  %v4817_v61 = vmax.f32 %v3700_v49, 0.0  ;;  %3353 = vmatmul.mubr.msk.bf16.gmra.mxu0 %vm1425_vm3, %v4236_v17 }
 0x133   : > { %v880_v63 = vrot.slane %v4238_v20, 7  ;;  %v899_v36 = vrot.slane %v4240_v10, 7  ;;  %v1065_v3 = vsel %vm1050_vm1, %v1028_v4, %v1046_v33  ;;  %v1083_v60 = vsel %vm1050_vm1, %v1046_v33, %v1028_v4 }
 0x134   : > { %v4258_v54 = vmul.f32 0.0, %v4817_v61  ;;  %v4264_v58 = vmax.f32 %v738_v56, 0.0  ;;  %v915_v29 = vsel %vm901_vm0, %v878_v14, %v896_v9  ;;  %v1120_v49 = vsel %vm864_vm2, 0.0, %v1083_v60 }
 0x135   : > { %v933_v23 = vsel %vm901_vm0, %v896_v9, %v878_v14  ;;  %v918_v57 = vsel %vm901_vm0, %v881_v11, %v899_v36  ;;  %v936_v13 = vsel %vm901_vm0, %v899_v36, %v881_v11  ;;  %v900_v39 = vrot.slane %v4246_v62, 7  ;;  %1334 = vrot.lane.b32.xlu0 %v3938_v16, %s3533_s23  ;;  %1207 = vrot.lane.b32.xlu1 %v3977_v59, %s3533_s23 }
 0x136   : > { %v898_v4 = vrot.slane %v4264_v58, 7  ;;  %v4286_v33 = vpack.c.bf16 %v1120_v49, %v1065_v3  ;;  %v968_v14 = vsel %vm861_vm4, 0.0, %v933_v23  ;;  %v882_v9 = vrot.slane %v4258_v54, 7 }
 0x137   : > { %v4291_v56 = vpack.c.bf16 %v915_v29, %v968_v14  ;;  %v974_v11 = vsel %vm861_vm4, 0.0, %v936_v13  ;;  %v4297_v61 = vpack.c.bf16 %v3960_v45, %v3942_v18 }
 0x138   : > { %v4299_v36 = vpack.c.bf16 %v918_v57, %v974_v11  ;;  %v917_v3 = vsel %vm901_vm0, %v880_v63, %v898_v4  ;;  %v935_v60 = vsel %vm901_vm0, %v898_v4, %v880_v63  ;;  %v4315_v18 = vsel %vm901_vm0, %v882_v9, %v900_v39 }
 0x139   : > { %v972_v49 = vsel %vm861_vm4, 0.0, %v935_v60  ;;  %1405 = vrot.lane.b32.xlu0 %v4297_v61, %s3534_s24  ;;  %1303 = vrot.lane.b32.xlu1 %v4086_v12, %s3534_s24  ;;  %v937_v45 = vsel %vm901_vm0, %v900_v39, %v882_v9  ;;  %v4321_v63 = vpack.c.bf16 %v3971_v32, %v3952_v37 }
 0x13a   : > { %v4311_v29 = vpack.c.bf16 %v917_v3, %v972_v49  ;;  %v4325_v23 = vsel %vm861_vm4, 0.0, %v937_v45  ;;  %v4818_v3 = vpack.c.bf16 %v4167_v15, %v4179_v8 }
 0x13b   : > { %v995_v57 = vpack.c.bf16 %v4315_v18, %v4325_v23 }
 0x13d   : > { %1403 = vrot.lane.b32.xlu0 %v4321_v63, %s3534_s24  ;;  %1257 = vrot.lane.b32.xlu1 %v3940_v19, %s3535_s16  ;;  %v4351_v19 = vpack.c.bf16 %v4036_v31, %v4014_v5 }
 0x141   : > { %1371 = vrot.lane.b32.xlu0 %v4057_v0, %s3535_s16  ;;  %1301 = vrot.lane.b32.xlu1 %v4092_v52, %s3534_s24 }
 0x145   : > { %1340 = vrot.lane.b32.xlu0 %v4012_v2, %s3533_s23  ;;  %1255 = vrot.lane.b32.xlu1 %v3938_v16, %s3535_s16  ;;  %v4359_v16 = vpack.c.bf16 %v4045_v22, %v4030_v51 }
 0x149   : > { %1369 = vrot.lane.b32.xlu0 %v4067_v46, %s3535_s16  ;;  %1213 = vrot.lane.b32.xlu1 %v4297_v61, %s3533_s23 }
 0x14d   : > { %1338 = vrot.lane.b32.xlu0 %v4024_v25, %s3533_s23  ;;  %1211 = vrot.lane.b32.xlu1 %v4321_v63, %s3533_s23 }
 0x151   : > { %1409 = vrot.lane.b32.xlu0 %v4351_v19, %s3534_s24  ;;  %1307 = vrot.lane.b32.xlu1 %v4057_v0, %s3534_s24 }
 0x155   : > { %1407 = vrot.lane.b32.xlu0 %v4359_v16, %s3534_s24  ;;  %1261 = vrot.lane.b32.xlu1 %v4012_v2, %s3535_s16 }
 0x159   : > { %1375 = vrot.lane.b32.xlu0 %v4128_v21, %s3535_s16  ;;  %1305 = vrot.lane.b32.xlu1 %v4067_v46, %s3534_s24 }
 0x15d   : > { %1344 = vrot.lane.b32.xlu0 %v4096_v7, %s3533_s23  ;;  %1259 = vrot.lane.b32.xlu1 %v4024_v25, %s3535_s16 }
 0x161   : > { %1373 = vrot.lane.b32.xlu0 %v4130_v43, %s3535_s16  ;;  %1217 = vrot.lane.b32.xlu1 %v4351_v19, %s3533_s23 }
 0x165   : > { %1342 = vrot.lane.b32.xlu0 %v4094_v35, %s3533_s23  ;;  %1215 = vrot.lane.b32.xlu1 %v4359_v16, %s3533_s23 }
 0x169   : > { %1413 = vrot.lane.b32.xlu0 %v4146_v41, %s3534_s24  ;;  %1311 = vrot.lane.b32.xlu1 %v4128_v21, %s3534_s24 }
 0x16b   : > { %v4385_v37 = vpop.permute.xlu1 %1201  ;;  %v1394_v32 = vpop.permute.xlu0 %1393 }
 0x16d   : > { %1411 = vrot.lane.b32.xlu0 %v4155_v38, %s3534_s24  ;;  %1265 = vrot.lane.b32.xlu1 %v4096_v7, %s3535_s16 }
 0x16f   : > { %v1200_v2 = vpop.permute.xlu1 %1199  ;;  %v1198_v5 = vpop.permute.xlu0 %1197 }
 0x170   : > { %v1428_v60 = vsel %vm1425_vm3, %v4818_v3, %v1198_v5  ;;  %v1431_v5 = vsel %vm1425_vm3, %v3902_v55, %v1200_v2  ;;  %v4460_v3 = vpack.c.bf16 %v4264_v58, %v4238_v20 }
 0x171   : > { %1379 = vrot.lane.b32.xlu0 %v4208_v53, %s3535_s16  ;;  %1309 = vrot.lane.b32.xlu1 %v4130_v43, %s3534_s24 }
 0x173   : > { %v1329_v25 = vpop.permute.xlu0 %1328  ;;  %v1360_v51 = vpop.permute.xlu1 %1359 }
 0x175   : > { %1348 = vrot.lane.b32.xlu0 %v4142_v42, %s3533_s23  ;;  %1263 = vrot.lane.b32.xlu1 %v4094_v35, %s3535_s16 }
 0x177   : > { %v1327_v31 = vpop.permute.xlu0 %1326  ;;  %v1296_v22 = vpop.permute.xlu1 %1295 }
 0x178   : > { %v1558_v7 = vsel %vm1425_vm3, %v3766_v28, %v1327_v31 }
 0x179   : > { %1377 = vrot.lane.b32.xlu0 %v4216_v1, %s3535_s16  ;;  %1221 = vrot.lane.b32.xlu1 %v4146_v41, %s3533_s23  ;;  %v1605_v13 = vsel %vm1474_vm5, %v1558_v7, %v1360_v51 }
 0x17a   : > { %v1637_v39 = vsel %vm1507_vm6, %v1605_v13, %v1394_v32  ;;  %v4819_v13 = vld [vmem:[#allocation4_spill] sm:$0xff] }
 0x17b   : > { %v1398_v4 = vpop.permute.xlu0 %1397  ;;  %v1250_v14 = vpop.permute.xlu1 %1249  ;;  %1879 = vmatprep.mubr.bf16.mxu1 %v1637_v39 }
 0x17d   : > { %1346 = vrot.lane.b32.xlu0 %v4175_v30, %s3533_s23  ;;  %1219 = vrot.lane.b32.xlu1 %v4155_v38, %s3533_s23 }
 0x17f   : > { %v1396_v28 = vpop.permute.xlu0 %1395  ;;  %v1294_v35 = vpop.permute.xlu1 %1293 }
 0x181   : > { %1417 = vrot.lane.b32.xlu0 %v4206_v40, %s3534_s24  ;;  %1315 = vrot.lane.b32.xlu1 %v4208_v53, %s3534_s24 }
 0x183   : > { %v1364_v9 = vpop.permute.xlu0 %1363  ;;  %v1248_v11 = vpop.permute.xlu1 %1247 }
 0x185   : > { %1415 = vrot.lane.b32.xlu0 %v4220_v48, %s3534_s24  ;;  %1269 = vrot.lane.b32.xlu1 %v4142_v42, %s3535_s16  ;;  %v1561_v42 = vsel %vm1425_vm3, %v3734_v6, %v1329_v25  ;;  %v1478_v25 = vsel %vm1474_vm5, %v1431_v5, %v1248_v11 }
 0x186   : > { %v1512_v55 = vsel %vm1507_vm6, %v1478_v25, %v1296_v22  ;;  %v4820_v22 = vld [vmem:[#allocation2_spill] sm:$0xff] }
 0x187   : > { %v1333_v49 = vpop.permute.xlu0 %1332  ;;  %v1246_v45 = vpop.permute.xlu1 %1245 }
 0x188   : > { %v1476_v32 = vsel %vm1474_vm5, %v1428_v60, %v1246_v45 }
 0x189   : > { %1383 = vrot.lane.b32.xlu0 %v4253_v47, %s3535_s16  ;;  %1313 = vrot.lane.b32.xlu1 %v4216_v1, %s3534_s24  ;;  %v1509_v51 = vsel %vm1507_vm6, %v1476_v32, %v1294_v35 }
 0x18a   : > { %1880 = vmatmul.mubr.bf16.vlgmr.msra.gmra.mxu1 %v1509_v51  ;;  %v1029_v51 = vrot.slane %v4238_v20, 1 }
 0x18b   : > { %v1362_v31 = vpop.permute.xlu0 %1361  ;;  %v4431_v15 = vpop.permute.xlu1 %1205  ;;  %3402 = vmatpush3.bf16.msra.mxu1 %v3660_v26 }
 0x18c   : > { %v1607_v8 = vsel %vm1474_vm5, %v1561_v42, %v1362_v31  ;;  %3401 = vmatprep.subr.bf16.mxu1 %v3667_v27  ;;  %v1047_v42 = vrot.slane %v4264_v58, 1  ;;  %v4821_v58 = vld [vmem:[#allocation6_spill] sm:$0xff] }
 0x18d   : > { %1352 = vrot.lane.b32.xlu0 %v4286_v33, %s3533_s23  ;;  %1267 = vrot.lane.b32.xlu1 %v4175_v30, %s3535_s16  ;;  %v1640_v6 = vsel %vm1507_vm6, %v1607_v8, %v1396_v28 }
 0x18e   : > { %1887 = vmatprep.mubr.bf16.mxu1 %v1640_v6  ;;  %v1084_v20 = vsel %vm1050_vm1, %v1047_v42, %v1029_v51  ;;  %v4822_v6 = vld [vmem:[#allocation3_spill] sm:$0xff] }
 0x18f   : > { %v1331_v7 = vpop.permute.xlu0 %1330  ;;  %v1204_v26 = vpop.permute.xlu1 %1203  ;;  %3403 = vmatpush3.bf16.msra.mxu1 %v3667_v27  ;;  %v1567_v25 = vsel %vm1425_vm3, %v4822_v6, %v1333_v49 }
 0x190   : > { %v1564_v39 = vsel %vm1425_vm3, %v4819_v13, %v1331_v7  ;;  %v1437_v5 = vsel %vm1425_vm3, %v4821_v58, %v1204_v26  ;;  %v1122_v26 = vsel %vm864_vm2, 0.0, %v1084_v20 }
 0x191   : > { %1381 = vrot.lane.b32.xlu0 %v4291_v56, %s3535_s16  ;;  %1225 = vrot.lane.b32.xlu1 %v4206_v40, %s3533_s23  ;;  %v1609_v30 = vsel %vm1474_vm5, %v1564_v39, %v1364_v9 }
 0x192   : > { %1888 = vmatmul.mubr.bf16.gmra.mxu1 %v1512_v55  ;;  %v1643_v2 = vsel %vm1507_vm6, %v1609_v30, %v1398_v4  ;;  %v1434_v4 = vsel %vm1425_vm3, %v4820_v22, %v4385_v37  ;;  %v1030_v37 = vrot.slane %v4230_v24, 1  ;;  %v4494_v55 = vpack.c.bf16 %v4240_v10, %v4230_v24 }
 0x193   : > { %v1402_v28 = vpop.permute.xlu0 %1401  ;;  %v1300_v35 = vpop.permute.xlu1 %1299  ;;  %1895 = vmatprep.mubr.bf16.mxu1 %v1643_v2  ;;  %v1480_v9 = vsel %vm1474_vm5, %v1434_v4, %v1250_v14  ;;  %v1048_v14 = vrot.slane %v4240_v10, 1  ;;  %v1066_v30 = vsel %vm1050_vm1, %v1029_v51, %v1047_v42 }
 0x194   : > { %v4509_v4 = vpack.c.bf16 %v1122_v26, %v1066_v30 }
 0x195   : > { %1350 = vrot.lane.b32.xlu0 %v4236_v17, %s3533_s23  ;;  %1223 = vrot.lane.b32.xlu1 %v4220_v48, %s3533_s23  ;;  %v1085_v24 = vsel %vm1050_vm1, %v1048_v14, %v1030_v37 }
 0x197   : > { %v1400_v27 = vpop.permute.xlu0 %1399  ;;  %v1254_v11 = vpop.permute.xlu1 %1253 }
 0x199   : > { %1419 = vrot.lane.b32.xlu0 %v4460_v3, %s3534_s24  ;;  %1319 = vrot.lane.b32.xlu1 %v4253_v47, %s3534_s24 }
 0x19b   : > { %v1368_v60 = vpop.permute.xlu0 %1367  ;;  %v1298_v45 = vpop.permute.xlu1 %1297 }
 0x19c   : > { %v1515_v32 = vsel %vm1507_vm6, %v1480_v9, %v1298_v45  ;;  %v1067_v45 = vsel %vm1050_vm1, %v1030_v37, %v1048_v14 }
 0x19d   : > { %1387 = vrot.lane.b32.xlu0 %v4299_v36, %s3535_s16  ;;  %1317 = vrot.lane.b32.xlu1 %v4291_v56, %s3534_s24 }
 0x19e   : > { %1896 = vmatmul.mubr.bf16.gmra.mxu1 %v1515_v32 }
 0x19f   : > { %v1337_v31 = vpop.permute.xlu0 %1336  ;;  %v1252_v8 = vpop.permute.xlu1 %1251 }
 0x1a0   : > { %v1482_v7 = vsel %vm1474_vm5, %v1437_v5, %v1252_v8  ;;  %v1013_v5 = vpack.c.bf16 %v4246_v62, %v4258_v54 }
 0x1a1   : > { %1385 = vrot.lane.b32.xlu0 %v4311_v29, %s3535_s16  ;;  %1271 = vrot.lane.b32.xlu1 %v4236_v17, %s3535_s16  ;;  %v1518_v10 = vsel %vm1507_vm6, %v1482_v7, %v1300_v35 }
 0x1a3   : > { %v1366_v13 = vpop.permute.xlu0 %1365  ;;  %v4490_v39 = vpop.permute.xlu1 %1209 }
 0x1a4   : > { %v1611_v17 = vsel %vm1474_vm5, %v1567_v25, %v1366_v13 }
 0x1a5   : > { %1421 = vrot.lane.b32.xlu0 %v4494_v55, %s3534_s24  ;;  %1273 = vrot.lane.b32.xlu1 %v4286_v33, %s3535_s16  ;;  %v1646_v49 = vsel %vm1507_vm6, %v1611_v17, %v1400_v27  ;;  %v1124_v27 = vsel %vm864_vm2, 0.0, %v1085_v24 }
 0x1a6   : > { %1903 = vmatprep.mubr.bf16.mxu1 %v1646_v49 }
 0x1a7   : > { %v1335_v2 = vpop.permute.xlu0 %1334  ;;  %v1208_v22 = vpop.permute.xlu1 %1207  ;;  %1904 = vmatmul.mubr.bf16.gmra.mxu1 %v1518_v10 }
 0x1a8   : > { %v1570_v9 = vsel %vm1425_vm3, %v3977_v59, %v1335_v2  ;;  %v4523_v59 = vpack.c.bf16 %v1124_v27, %v1067_v45 }
 0x1a9   : > { %1354 = vrot.lane.b32.xlu0 %v4509_v4, %s3533_s23  ;;  %1227 = vrot.lane.b32.xlu1 %v4460_v3, %s3533_s23  ;;  %v1613_v35 = vsel %vm1474_vm5, %v1570_v9, %v1368_v60 }
 0x1aa   : > { %v1649_v32 = vsel %vm1507_vm6, %v1613_v35, %v1402_v28  ;;  %v4823_v28 = vld [vmem:[#allocation5_spill] sm:$0xff] }
 0x1ab   : > { %v1406_v51 = vpop.permute.xlu0 %1405  ;;  %v1304_v42 = vpop.permute.xlu1 %1303  ;;  %1911 = vmatprep.mubr.bf16.mxu1 %v1649_v32  ;;  %v1440_v60 = vsel %vm1425_vm3, %v4823_v28, %v4431_v15  ;;  %v1573_v15 = vsel %vm1425_vm3, %v3968_v50, %v1337_v31 }
 0x1ac   : > { %v1484_v14 = vsel %vm1474_vm5, %v1440_v60, %v1254_v11 }
 0x1ad   : > { %1356 = vrot.lane.b32.xlu0 %v4523_v59, %s3533_s23  ;;  %1321 = vrot.lane.b32.xlu1 %v4311_v29, %s3534_s24 }
 0x1af   : > { %v1404_v8 = vpop.permute.xlu0 %1403  ;;  %v1258_v37 = vpop.permute.xlu1 %1257 }
 0x1b1   : > { %1389 = vrot.lane.b32.xlu0 %v995_v57, %s3535_s16  ;;  %1275 = vrot.lane.b32.xlu1 %v4509_v4, %s3535_s16  ;;  %v1443_v57 = vsel %vm1425_vm3, %v4092_v52, %v1208_v22  ;;  %v1446_v22 = vsel %vm1425_vm3, %v4086_v12, %v4490_v39 }
 0x1b2   : > { %v1488_v9 = vsel %vm1474_vm5, %v1446_v22, %v1258_v37 }
 0x1b3   : > { %v1372_v20 = vpop.permute.xlu0 %1371  ;;  %v1302_v58 = vpop.permute.xlu1 %1301 }
 0x1b4   : > { %v1521_v6 = vsel %vm1507_vm6, %v1484_v14, %v1302_v58 }
 0x1b5   : > { %1423 = vrot.lane.b32.xlu0 %v1013_v5, %s3534_s24  ;;  %1323 = vrot.lane.b32.xlu1 %v4299_v36, %s3534_s24 }
 0x1b6   : > { %1912 = vmatmul.mubr.bf16.gmra.mxu1 %v1521_v6 }
 0x1b7   : > { %v1341_v18 = vpop.permute.xlu0 %1340  ;;  %v1256_v23 = vpop.permute.xlu1 %1255 }
 0x1b8   : > { %v1486_v11 = vsel %vm1474_vm5, %v1443_v57, %v1256_v23  ;;  %v3475_v57 = vld [vmem:[%s4799_s6 + $0x8] sm:$0xff]  }
 0x1b9   : > { %v1524_v36 = vsel %vm1507_vm6, %v1486_v11, %v1304_v42  ;;  %v1579_v42 = vsel %vm1425_vm3, %v4297_v61, %v1341_v18  ;;  %3364 = vmatprep.subr.bf16.mxu0 %v3475_v57 }
 0x1ba   : > { %3365 = vmatpush3.bf16.msra.mxu0 %v3475_v57 }
 0x1bb   : > { %v1370_v25 = vpop.permute.xlu0 %1369  ;;  %v1214_v7 = vpop.permute.xlu1 %1213 }
 0x1bc   : > { %v1615_v13 = vsel %vm1474_vm5, %v1573_v15, %v1370_v25  ;;  %v1452_v15 = vsel %vm1425_vm3, %v4057_v0, %v1214_v7 }
 0x1bd   : > { %v1652_v17 = vsel %vm1507_vm6, %v1615_v13, %v1404_v8 }
 0x1be   : > { %1919 = vmatprep.mubr.bf16.mxu1 %v1652_v17 }
 0x1bf   : > { %v1339_v30 = vpop.permute.xlu0 %1338  ;;  %v1212_v26 = vpop.permute.xlu1 %1211  ;;  %1920 = vmatmul.mubr.bf16.gmra.mxu1 %v1524_v36 }
 0x1c0   : > { %v1576_v52 = vsel %vm1425_vm3, %v4321_v63, %v1339_v30  ;;  %v3476_v30 = vld [vmem:[%s4799_s6] sm:$0xff]  }
 0x1c1   : > { %v1617_v49 = vsel %vm1474_vm5, %v1576_v52, %v1372_v20  ;;  %3366 = vmatprep.subr.bf16.mxu0 %v3476_v30 }
 0x1c2   : > { %v1655_v50 = vsel %vm1507_vm6, %v1617_v49, %v1406_v51  ;;  %v1449_v51 = vsel %vm1425_vm3, %v4067_v46, %v1212_v26  ;;  %3367 = vmatpush3.bf16.msra.mxu0 %v3476_v30 }
 0x1c3   : > { %v1410_v31 = vpop.permute.xlu0 %1409  ;;  %v1308_v24 = vpop.permute.xlu1 %1307  ;;  %1927 = vmatprep.mubr.bf16.mxu1 %v1655_v50 }
 0x1c7   : > { %v1408_v10 = vpop.permute.xlu0 %1407  ;;  %v1262_v2 = vpop.permute.xlu1 %1261 }
 0x1c8   : > { %v1492_v11 = vsel %vm1474_vm5, %v1452_v15, %v1262_v2 }
 0x1cb   : > { %v1376_v45 = vpop.permute.xlu0 %1375  ;;  %v1306_v27 = vpop.permute.xlu1 %1305 }
 0x1cc   : > { %v1527_v35 = vsel %vm1507_vm6, %v1488_v9, %v1306_v27 }
 0x1cd   : > { %1928 = vmatmul.mubr.bf16.gmra.mxu1 %v1527_v35 }
 0x1cf   : > { %v1345_v63 = vpop.permute.xlu0 %1344  ;;  %v1260_v32 = vpop.permute.xlu1 %1259 }
 0x1d0   : > { %v1490_v8 = vsel %vm1474_vm5, %v1449_v51, %v1260_v32  ;;  %v1585_v0 = vsel %vm1425_vm3, %v4351_v19, %v1345_v63 }
 0x1d1   : > { %v1530_v37 = vsel %vm1507_vm6, %v1490_v8, %v1308_v24 }
 0x1d3   : > { %v1374_v28 = vpop.permute.xlu0 %1373  ;;  %v1218_v60 = vpop.permute.xlu1 %1217 }
 0x1d4   : > { %v1619_v12 = vsel %vm1474_vm5, %v1579_v42, %v1374_v28  ;;  %v1458_v63 = vsel %vm1425_vm3, %v4128_v21, %v1218_v60 }
 0x1d5   : > { %v1658_v39 = vsel %vm1507_vm6, %v1619_v12, %v1408_v10 }
 0x1d6   : > { %1935 = vmatprep.mubr.bf16.mxu1 %v1658_v39 }
 0x1d7   : > { %v1343_v14 = vpop.permute.xlu0 %1342  ;;  %v1216_v20 = vpop.permute.xlu1 %1215  ;;  %1936 = vmatmul.mubr.bf16.gmra.mxu1 %v1530_v37 }
 0x1d8   : > { %v1582_v46 = vsel %vm1425_vm3, %v4359_v16, %v1343_v14  ;;  %v1455_v26 = vsel %vm1425_vm3, %v4130_v43, %v1216_v20 }
 0x1d9   : > { %v1621_v58 = vsel %vm1474_vm5, %v1582_v46, %v1376_v45 }
 0x1da   : > { %v1661_v61 = vsel %vm1507_vm6, %v1621_v58, %v1410_v31 }
 0x1db   : > { %v1414_v5 = vpop.permute.xlu0 %1413  ;;  %v1312_v6 = vpop.permute.xlu1 %1311  ;;  %1943 = vmatprep.mubr.bf16.mxu1 %v1661_v61 }
 0x1df   : > { %v1412_v18 = vpop.permute.xlu0 %1411  ;;  %v1266_v23 = vpop.permute.xlu1 %1265 }
 0x1e0   : > { %v1496_v32 = vsel %vm1474_vm5, %v1458_v63, %v1266_v23 }
 0x1e3   : > { %v1380_v25 = vpop.permute.xlu0 %1379  ;;  %v1310_v16 = vpop.permute.xlu1 %1309 }
 0x1e4   : > { %v1533_v13 = vsel %vm1507_vm6, %v1492_v11, %v1310_v16 }
 0x1e5   : > { %1944 = vmatmul.mubr.bf16.gmra.mxu1 %v1533_v13 }
 0x1e7   : > { %v1349_v17 = vpop.permute.xlu0 %1348  ;;  %v1264_v36 = vpop.permute.xlu1 %1263 }
 0x1e8   : > { %v1494_v7 = vsel %vm1474_vm5, %v1455_v26, %v1264_v36  ;;  %v1591_v39 = vsel %vm1425_vm3, %v4146_v41, %v1349_v17 }
 0x1e9   : > { %v1536_v24 = vsel %vm1507_vm6, %v1494_v7, %v1312_v6 }
 0x1eb   : > { %v1378_v52 = vpop.permute.xlu0 %1377  ;;  %v1222_v49 = vpop.permute.xlu1 %1221 }
 0x1ec   : > { %v1623_v50 = vsel %vm1474_vm5, %v1585_v0, %v1378_v52  ;;  %v1464_v23 = vsel %vm1425_vm3, %v4208_v53, %v1222_v49 }
 0x1ed   : > { %v1664_v31 = vsel %vm1507_vm6, %v1623_v50, %v1412_v18 }
 0x1ee   : > { %1951 = vmatprep.mubr.bf16.mxu1 %v1664_v31 }
 0x1ef   : > { %v1347_v10 = vpop.permute.xlu0 %1346  ;;  %v1220_v2 = vpop.permute.xlu1 %1219  ;;  %1952 = vmatmul.mubr.bf16.gmra.mxu1 %v1536_v24 }
 0x1f0   : > { %v1588_v43 = vsel %vm1425_vm3, %v4155_v38, %v1347_v10  ;;  %v1461_v12 = vsel %vm1425_vm3, %v4216_v1, %v1220_v2 }
 0x1f1   : > { %v1625_v22 = vsel %vm1474_vm5, %v1588_v43, %v1380_v25 }
 0x1f2   : > { %v1667_v19 = vsel %vm1507_vm6, %v1625_v22, %v1414_v5 }
 0x1f3   : > { %v1418_v9 = vpop.permute.xlu0 %1417  ;;  %v1316_v45 = vpop.permute.xlu1 %1315  ;;  %1959 = vmatprep.mubr.bf16.mxu1 %v1667_v19 }
 0x1f7   : > { %v1416_v27 = vpop.permute.xlu0 %1415  ;;  %v1270_v35 = vpop.permute.xlu1 %1269 }
 0x1f8   : > { %v1500_v57 = vsel %vm1474_vm5, %v1464_v23, %v1270_v35 }
 0x1fb   : > { %v1384_v51 = vpop.permute.xlu0 %1383  ;;  %v1314_v42 = vpop.permute.xlu1 %1313 }
 0x1fc   : > { %v1539_v8 = vsel %vm1507_vm6, %v1496_v32, %v1314_v42 }
 0x1fd   : > { %1960 = vmatmul.mubr.bf16.gmra.mxu1 %v1539_v8 }
 0x1ff   : > { %v1353_v38 = vpop.permute.xlu0 %1352  ;;  %v1268_v28 = vpop.permute.xlu1 %1267 }
 0x200   : > { %v1498_v37 = vsel %vm1474_vm5, %v1461_v12, %v1268_v28 }
 0x201   : > { %v1542_v46 = vsel %vm1507_vm6, %v1498_v37, %v1316_v45 }
 0x203   : > { %v1382_v14 = vpop.permute.xlu0 %1381  ;;  %v1226_v20 = vpop.permute.xlu1 %1225 }
 0x204   : > { %v1627_v21 = vsel %vm1474_vm5, %v1591_v39, %v1382_v14 }
 0x205   : > { %v1670_v60 = vsel %vm1507_vm6, %v1627_v21, %v1416_v27 }
 0x206   : > { %1967 = vmatprep.mubr.bf16.mxu1 %v1670_v60 }
 0x207   : > { %v1351_v58 = vpop.permute.xlu0 %1350  ;;  %v1224_v61 = vpop.permute.xlu1 %1223  ;;  %1968 = vmatmul.mubr.bf16.gmra.mxu1 %v1542_v46 }
 0x208   : > { %v1594_v1 = vsel %vm1425_vm3, %v4220_v48, %v1351_v58  ;;  %v1597_v48 = vsel %vm1425_vm3, %v4206_v40, %v1353_v38  ;;  %v1467_v17 = vsel %vm1425_vm3, %v4291_v56, %v1224_v61  ;;  %v1470_v56 = vsel %vm1425_vm3, %v4253_v47, %v1226_v20 }
 0x209   : > { %v1629_v5 = vsel %vm1474_vm5, %v1594_v1, %v1384_v51  ;;  %v1031_v51 = vrot.slane %v4258_v54, 1 }
 0x20a   : > { %v1673_v41 = vsel %vm1507_vm6, %v1629_v5, %v1418_v9 }
 0x20b   : > { %v1420_v6 = vpop.permute.xlu0 %1419  ;;  %v1320_v18 = vpop.permute.xlu1 %1319  ;;  %1975 = vmatprep.mubr.bf16.mxu1 %v1673_v41 }
 0x20f   : > { %v1388_v15 = vpop.permute.xlu0 %1387  ;;  %v1318_v11 = vpop.permute.xlu1 %1317 }
 0x210   : > { %v1545_v25 = vsel %vm1507_vm6, %v1500_v57, %v1318_v11 }
 0x211   : > { %1976 = vmatmul.mubr.bf16.gmra.mxu1 %v1545_v25 }
 0x213   : > { %v1386_v16 = vpop.permute.xlu0 %1385  ;;  %v1272_v13 = vpop.permute.xlu1 %1271 }
 0x214   : > { %v1631_v36 = vsel %vm1474_vm5, %v1597_v48, %v1386_v16  ;;  %v1502_v30 = vsel %vm1474_vm5, %v1467_v17, %v1272_v13 }
 0x215   : > { %v1676_v53 = vsel %vm1507_vm6, %v1631_v36, %v1420_v6  ;;  %v1548_v7 = vsel %vm1507_vm6, %v1502_v30, %v1320_v18 }
 0x216   : > { %1983 = vmatprep.mubr.bf16.mxu1 %v1676_v53 }
 0x217   : > { %v1422_v26 = vpop.permute.xlu0 %1421  ;;  %v1274_v0 = vpop.permute.xlu1 %1273 }
 0x218   : > { %v1504_v24 = vsel %vm1474_vm5, %v1470_v56, %v1274_v0 }
 0x219   : > { %1984 = vmatmul.mubr.bf16.gmra.mxu1 %v1548_v7 }
 0x21b   : > { %v1355_v52 = vpop.permute.xlu0 %1354  ;;  %v1228_v49 = vpop.permute.xlu1 %1227 }
 0x21c   : > { %v1600_v40 = vsel %vm1425_vm3, %v4460_v3, %v1355_v52  ;;  %v1473_v3 = vsel %vm1425_vm3, %v4311_v29, %v1228_v49  ;;  %v1049_v29 = vrot.slane %v4246_v62, 1  ;;  %v3334_v62 = vpop.f32.mrf.mxu0 }
 0x21d   : > { %v1633_v50 = vsel %vm1474_vm5, %v1600_v40, %v1388_v15 }
 0x21e   : > { %v1679_v31 = vsel %vm1507_vm6, %v1633_v50, %v1422_v26  ;;  %v1068_v42 = vsel %vm1050_vm1, %v1031_v51, %v1049_v29  ;;  %v2042_v38 = vpop.f32.mrf.mxu0 }
 0x21f   : > { %v1357_v10 = vpop.permute.xlu0 %1356  ;;  %v1322_v2 = vpop.permute.xlu1 %1321  ;;  %1991 = vmatprep.mubr.bf16.mxu1 %v1679_v31 }
 0x220   : > { %v1551_v43 = vsel %vm1507_vm6, %v1504_v24, %v1322_v2  ;;  %v1603_v9 = vsel %vm1425_vm3, %v4494_v55, %v1357_v10  ;;  %v1086_v55 = vsel %vm1050_vm1, %v1049_v29, %v1031_v51  ;;  %v3335_v39 = vpop.f32.mrf.mxu0 }
 0x221   : > { %1992 = vmatmul.mubr.bf16.gmra.mxu1 %v1551_v43  ;;  %v1126_v8 = vsel %vm864_vm2, 0.0, %v1086_v55 }
 0x222   : > { %v2045_v60 = vpop.f32.mrf.mxu0 }
 0x223   : > { %v1390_v22 = vpop.permute.xlu0 %1389  ;;  %v1276_v19 = vpop.permute.xlu1 %1275 }
 0x224   : > { %v1635_v47 = vsel %vm1474_vm5, %v1603_v9, %v1390_v22  ;;  %v1506_v45 = vsel %vm1474_vm5, %v1473_v3, %v1276_v19  ;;  %v3338_v25 = vpop.f32.mrf.mxu0 }
 0x226   : > { %v2058_v36 = vpop.f32.mrf.mxu0 }
 0x227   : > { %v1424_v27 = vpop.permute.xlu0 %1423  ;;  %v1324_v35 = vpop.permute.xlu1 %1323 }
 0x228   : > { %v1682_v63 = vsel %vm1507_vm6, %v1635_v47, %v1424_v27  ;;  %v1554_v32 = vsel %vm1507_vm6, %v1506_v45, %v1324_v35  ;;  %v3339_v52 = vpop.f32.mrf.mxu0 }
 0x229   : > { %1999 = vmatprep.mubr.bf16.mxu1 %v1682_v63 }
 0x22a   : > { %2000 = vmatmul.mubr.bf16.gmra.mxu1 %v1554_v32  ;;  %v2061_v24 = vpop.f32.mrf.mxu0 }
 0x22b   : > { %3356 = vmatprep.mubr.msk.bf16.mxu1 %vm1425_vm3, %v4286_v33  ;;  %v1144_v33 = vpack.c.bf16 %v1126_v8, %v1068_v42 }
 0x22c   : > { %v3342_v29 = vpop.f32.mrf.mxu0 }
 0x232   : > { %3357 = vmatmul.mubr.msk.bf16.vlgmr.msra.gmra.mxu1 %vm1425_vm3, %v4509_v4  ;;  %v4658_v4 = vld [vmem:[%s4798_s5] ss:$0 sm:$0xff] }
 0x233   : > { %3360 = vmatprep.mubr.msk.bf16.mxu1 %vm1425_vm3, %v4523_v59 }
 0x23a   : > { %3361 = vmatmul.mubr.msk.bf16.gmra.mxu1 %vm1425_vm3, %v1144_v33  ;;  %v2074_v33 = vpop.f32.mrf.mxu0 }
 0x24a   : > { %v3128_v54 = vpop.f32.mrf.mxu1 }
 0x24c   : > { %v3129_v28 = vpop.f32.mrf.mxu1 }
 0x24d   : > { %v3130_v12 = vadd.f32 %v3129_v28, %v3128_v54 }
 0x24e   : > { %v3131_v59 = vpop.f32.mrf.mxu1 }
 0x24f   : > { %v1882_v34 = vadd.f32 %v3130_v12, %v4658_v4  ;;  %v3343_v12 = vpop.f32.mrf.mxu0 }
 0x250   : > { %v3132_v37 = vpop.f32.mrf.mxu1 }
 0x251   : > { %v3133_v44 = vadd.f32 %v3132_v37, %v3131_v59  ;;  %v2043_v20 = vadd.f32 %v2042_v38, %v1882_v34 }
 0x252   : > { %v3134_v14 = vpop.f32.mrf.mxu1 }
 0x253   : > { %v1885_v21 = vadd.f32 %v3133_v44, %v4658_v4  ;;  %v2169_v5 = vmax.f32 %v2043_v20, 0.0 }
 0x254   : > { %v3135_v46 = vpop.f32.mrf.mxu1 }
 0x255   : > { %v2046_v58 = vadd.f32 %v2045_v60, %v1885_v21  ;;  %v3136_v61 = vadd.f32 %v3135_v46, %v3134_v14  ;;  %v2077_v14 = vpop.f32.mrf.mxu0 }
 0x256   : > { %v3137_v1 = vpop.f32.mrf.mxu1 }
 0x257   : > { %v2170_v41 = vmax.f32 %v2046_v58, 0.0  ;;  %v1890_v6 = vadd.f32 %v3136_v61, %v4658_v4 }
 0x258   : > { %v3138_v18 = vpop.f32.mrf.mxu1 }
 0x259   : > { %v2201_v23 = vpack.c.bf16 %v2170_v41, %v2169_v5  ;;  %v3139_v57 = vadd.f32 %v3138_v18, %v3137_v1  ;;  %v2051_v15 = vadd.f32 %v3334_v62, %v1890_v6 }
 0x25b   : > { %v1893_v11 = vadd.f32 %v3139_v57, %v4658_v4  ;;  %3368 = vmatprep.mubr.msk.bf16.mxu0 %vm1425_vm3, %v2201_v23  ;;  %v2171_v13 = vmax.f32 %v2051_v15, 0.0  ;;  %v3346_v15 = vpop.f32.mrf.mxu0 }
 0x25d   : > { %v2054_v48 = vadd.f32 %v3335_v39, %v1893_v11 }
 0x25e   : > { %v3140_v16 = vpop.f32.mrf.mxu1 }
 0x25f   : > { %v2172_v17 = vmax.f32 %v2054_v48, 0.0 }
 0x260   : > { %v3141_v30 = vpop.f32.mrf.mxu1 }
 0x261   : > { %v2202_v53 = vpack.c.bf16 %v2172_v17, %v2171_v13  ;;  %v3142_v26 = vadd.f32 %v3141_v30, %v3140_v16  ;;  %v2090_v13 = vpop.f32.mrf.mxu0 }
 0x262   : > { %v3143_v0 = vpop.f32.mrf.mxu1 }
 0x263   : > { %v1898_v7 = vadd.f32 %v3142_v26, %v4658_v4  ;;  %3369 = vmatmul.mubr.msk.bf16.vlgmr.msra.gmra.mxu0 %vm1425_vm3, %v2202_v53  ;;  %v3347_v26 = vpop.f32.mrf.mxu0 }
 0x264   : > { %v3144_v49 = vpop.f32.mrf.mxu1 }
 0x265   : > { %v3145_v40 = vadd.f32 %v3144_v49, %v3143_v0  ;;  %v2059_v50 = vadd.f32 %v2058_v36, %v1898_v7 }
 0x267   : > { %v1901_v56 = vadd.f32 %v3145_v40, %v4658_v4  ;;  %v3146_v31 = vpop.f32.mrf.mxu1  ;;  %v2173_v22 = vmax.f32 %v2059_v50, 0.0  ;;  %v2093_v40 = vpop.f32.mrf.mxu0 }
 0x269   : > { %v2062_v10 = vadd.f32 %v2061_v24, %v1901_v56  ;;  %v3147_v2 = vpop.f32.mrf.mxu1 }
 0x26a   : > { %v3148_v43 = vadd.f32 %v3147_v2, %v3146_v31 }
 0x26b   : > { %v2174_v19 = vmax.f32 %v2062_v10, 0.0  ;;  %v3149_v3 = vpop.f32.mrf.mxu1 }
 0x26c   : > { %v1906_v9 = vadd.f32 %v3148_v43, %v4658_v4 }
 0x26d   : > { %v2203_v47 = vpack.c.bf16 %v2174_v19, %v2173_v22  ;;  %v3150_v45 = vpop.f32.mrf.mxu1 }
 0x26e   : > { %v3151_v27 = vadd.f32 %v3150_v45, %v3149_v3  ;;  %v2067_v35 = vadd.f32 %v3338_v25, %v1906_v9 }
 0x26f   : > { %3372 = vmatprep.mubr.msk.bf16.mxu0 %vm1425_vm3, %v2203_v47 }
 0x270   : > { %v1909_v63 = vadd.f32 %v3151_v27, %v4658_v4  ;;  %v2175_v51 = vmax.f32 %v2067_v35, 0.0  ;;  %v3350_v35 = vpop.f32.mrf.mxu0 }
 0x272   : > { %v2070_v32 = vadd.f32 %v3339_v52, %v1909_v63 }
 0x274   : > { %v2176_v55 = vmax.f32 %v2070_v32, 0.0 }
 0x276   : > { %v2204_v42 = vpack.c.bf16 %v2176_v55, %v2175_v51  ;;  %v3152_v8 = vpop.f32.mrf.mxu1  ;;  %v2106_v55 = vpop.f32.mrf.mxu0 }
 0x278   : > { %v3153_v62 = vpop.f32.mrf.mxu1  ;;  %3373 = vmatmul.mubr.msk.bf16.gmra.mxu0 %vm1425_vm3, %v2204_v42 }
 0x279   : > { %v3154_v54 = vadd.f32 %v3153_v62, %v3152_v8 }
 0x27a   : > { %v3155_v38 = vpop.f32.mrf.mxu1 }
 0x27b   : > { %v1914_v28 = vadd.f32 %v3154_v54, %v4658_v4  ;;  %v3351_v54 = vpop.f32.mrf.mxu0 }
 0x27c   : > { %v3156_v59 = vpop.f32.mrf.mxu1 }
 0x27d   : > { %v3157_v34 = vadd.f32 %v3156_v59, %v3155_v38  ;;  %v2075_v39 = vadd.f32 %v2074_v33, %v1914_v28 }
 0x27f   : > { %v1917_v37 = vadd.f32 %v3157_v34, %v4658_v4  ;;  %v3158_v44 = vpop.f32.mrf.mxu1  ;;  %v2177_v46 = vmax.f32 %v2075_v39, 0.0  ;;  %v2109_v34 = vpop.f32.mrf.mxu0 }
 0x281   : > { %v2078_v20 = vadd.f32 %v2077_v14, %v1917_v37  ;;  %v3159_v21 = vpop.f32.mrf.mxu1 }
 0x282   : > { %v3160_v60 = vadd.f32 %v3159_v21, %v3158_v44 }
 0x283   : > { %v2178_v58 = vmax.f32 %v2078_v20, 0.0  ;;  %v3161_v61 = vpop.f32.mrf.mxu1 }
 0x284   : > { %v1922_v1 = vadd.f32 %v3160_v60, %v4658_v4 }
 0x285   : > { %v2205_v5 = vpack.c.bf16 %v2178_v58, %v2177_v46  ;;  %v3162_v41 = vpop.f32.mrf.mxu1 }
 0x286   : > { %v3163_v6 = vadd.f32 %v3162_v41, %v3161_v61  ;;  %v2083_v18 = vadd.f32 %v3342_v29, %v1922_v1 }
 0x287   : > { %3376 = vmatprep.mubr.msk.bf16.mxu0 %vm1425_vm3, %v2205_v5 }
 0x288   : > { %v1925_v23 = vadd.f32 %v3163_v6, %v4658_v4  ;;  %v2179_v11 = vmax.f32 %v2083_v18, 0.0  ;;  %v3354_v18 = vpop.f32.mrf.mxu0 }
 0x28a   : > { %v2086_v57 = vadd.f32 %v3343_v12, %v1925_v23 }
 0x28c   : > { %v2180_v25 = vmax.f32 %v2086_v57, 0.0 }
 0x28d   : > { %v3164_v48 = vpop.f32.mrf.mxu1 }
 0x28e   : > { %v2206_v16 = vpack.c.bf16 %v2180_v25, %v2179_v11  ;;  %v2122_v25 = vpop.f32.mrf.mxu0 }
 0x28f   : > { %v3165_v17 = vpop.f32.mrf.mxu1 }
 0x290   : > { %v3166_v36 = vadd.f32 %v3165_v17, %v3164_v48  ;;  %3377 = vmatmul.mubr.msk.bf16.gmra.mxu0 %vm1425_vm3, %v2206_v16 }
 0x291   : > { %v3167_v30 = vpop.f32.mrf.mxu1 }
 0x292   : > { %v1930_v53 = vadd.f32 %v3166_v36, %v4658_v4  ;;  %v3355_v36 = vpop.f32.mrf.mxu0 }
 0x293   : > { %v3168_v0 = vpop.f32.mrf.mxu1 }
 0x294   : > { %v3169_v7 = vadd.f32 %v3168_v0, %v3167_v30  ;;  %v2091_v52 = vadd.f32 %v2090_v13, %v1930_v53 }
 0x296   : > { %v1933_v49 = vadd.f32 %v3169_v7, %v4658_v4  ;;  %v2181_v24 = vmax.f32 %v2091_v52, 0.0  ;;  %v2125_v7 = vpop.f32.mrf.mxu0 }
 0x297   : > { %v3170_v50 = vpop.f32.mrf.mxu1 }
 0x298   : > { %v2094_v56 = vadd.f32 %v2093_v40, %v1933_v49 }
 0x299   : > { %v3171_v31 = vpop.f32.mrf.mxu1 }
 0x29a   : > { %v2182_v10 = vmax.f32 %v2094_v56, 0.0  ;;  %v3172_v2 = vadd.f32 %v3171_v31, %v3170_v50 }
 0x29b   : > { %v3173_v43 = vpop.f32.mrf.mxu1 }
 0x29c   : > { %v2207_v22 = vpack.c.bf16 %v2182_v10, %v2181_v24  ;;  %v1938_v19 = vadd.f32 %v3172_v2, %v4658_v4 }
 0x29d   : > { %v3174_v3 = vpop.f32.mrf.mxu1 }
 0x29e   : > { %v3175_v9 = vadd.f32 %v3174_v3, %v3173_v43  ;;  %3380 = vmatprep.mubr.msk.bf16.mxu0 %vm1425_vm3, %v2207_v22  ;;  %v2099_v47 = vadd.f32 %v3346_v15, %v1938_v19 }
 0x2a0   : > { %v1941_v45 = vadd.f32 %v3175_v9, %v4658_v4  ;;  %v2183_v63 = vmax.f32 %v2099_v47, 0.0 }
 0x2a2   : > { %v2102_v27 = vadd.f32 %v3347_v26, %v1941_v45 }
 0x2a4   : > { %v2184_v32 = vmax.f32 %v2102_v27, 0.0 }
 0x2a5   : > { %v3176_v29 = vpop.f32.mrf.mxu1 }
 0x2a6   : > { %v2208_v51 = vpack.c.bf16 %v2184_v32, %v2183_v63 }
 0x2a7   : > { %v3177_v42 = vpop.f32.mrf.mxu1 }
 0x2a8   : > { %v3178_v8 = vadd.f32 %v3177_v42, %v3176_v29  ;;  %3381 = vmatmul.mubr.msk.bf16.gmra.mxu0 %vm1425_vm3, %v2208_v51 }
 0x2a9   : > { %v3179_v33 = vpop.f32.mrf.mxu1 }
 0x2aa   : > { %v1946_v62 = vadd.f32 %v3178_v8, %v4658_v4 }
 0x2ab   : > { %v3180_v38 = vpop.f32.mrf.mxu1 }
 0x2ac   : > { %v3181_v28 = vadd.f32 %v3180_v38, %v3179_v33  ;;  %v2107_v12 = vadd.f32 %v2106_v55, %v1946_v62 }
 0x2ae   : > { %v1949_v59 = vadd.f32 %v3181_v28, %v4658_v4  ;;  %v2185_v14 = vmax.f32 %v2107_v12, 0.0 }
 0x2af   : > { %v3182_v39 = vpop.f32.mrf.mxu1 }
 0x2b0   : > { %v2110_v37 = vadd.f32 %v2109_v34, %v1949_v59 }
 0x2b1   : > { %v3183_v44 = vpop.f32.mrf.mxu1 }
 0x2b2   : > { %v2186_v20 = vmax.f32 %v2110_v37, 0.0  ;;  %v3184_v21 = vadd.f32 %v3183_v44, %v3182_v39 }
 0x2b3   : > { %v3185_v60 = vpop.f32.mrf.mxu1 }
 0x2b4   : > { %v2209_v46 = vpack.c.bf16 %v2186_v20, %v2185_v14  ;;  %v1954_v58 = vadd.f32 %v3184_v21, %v4658_v4 }
 0x2b5   : > { %v3186_v61 = vpop.f32.mrf.mxu1 }
 0x2b6   : > { %v3187_v1 = vadd.f32 %v3186_v61, %v3185_v60  ;;  %3384 = vmatprep.mubr.msk.bf16.mxu0 %vm1425_vm3, %v2209_v46  ;;  %v2115_v5 = vadd.f32 %v3350_v35, %v1954_v58 }
 0x2b8   : > { %v1957_v41 = vadd.f32 %v3187_v1, %v4658_v4  ;;  %v2187_v23 = vmax.f32 %v2115_v5, 0.0 }
 0x2ba   : > { %v2118_v6 = vadd.f32 %v3351_v54, %v1957_v41 }
 0x2bc   : > { %v2188_v57 = vmax.f32 %v2118_v6, 0.0 }
 0x2bd   : > { %v3188_v15 = vpop.f32.mrf.mxu1 }
 0x2be   : > { %v2210_v11 = vpack.c.bf16 %v2188_v57, %v2187_v23 }
 0x2bf   : > { %v3189_v48 = vpop.f32.mrf.mxu1 }
 0x2c0   : > { %v3190_v16 = vadd.f32 %v3189_v48, %v3188_v15  ;;  %3385 = vmatmul.mubr.msk.bf16.gmra.mxu0 %vm1425_vm3, %v2210_v11 }
 0x2c1   : > { %v3191_v13 = vpop.f32.mrf.mxu1 }
 0x2c2   : > { %v1962_v17 = vadd.f32 %v3190_v16, %v4658_v4 }
 0x2c3   : > { %v3192_v30 = vpop.f32.mrf.mxu1 }
 0x2c4   : > { %v3193_v53 = vadd.f32 %v3192_v30, %v3191_v13  ;;  %v2123_v26 = vadd.f32 %v2122_v25, %v1962_v17 }
 0x2c6   : > { %v1965_v0 = vadd.f32 %v3193_v53, %v4658_v4  ;;  %v2189_v50 = vmax.f32 %v2123_v26, 0.0 }
 0x2c7   : > { %v3194_v52 = vpop.f32.mrf.mxu1 }
 0x2c8   : > { %v2126_v49 = vadd.f32 %v2125_v7, %v1965_v0 }
 0x2c9   : > { %v3195_v40 = vpop.f32.mrf.mxu1 }
 0x2ca   : > { %v2190_v56 = vmax.f32 %v2126_v49, 0.0  ;;  %v3196_v31 = vadd.f32 %v3195_v40, %v3194_v52 }
 0x2cb   : > { %v3197_v24 = vpop.f32.mrf.mxu1 }
 0x2cc   : > { %v2211_v10 = vpack.c.bf16 %v2190_v56, %v2189_v50  ;;  %v1970_v2 = vadd.f32 %v3196_v31, %v4658_v4 }
 0x2cd   : > { %v3198_v43 = vpop.f32.mrf.mxu1 }
 0x2ce   : > { %v3199_v22 = vadd.f32 %v3198_v43, %v3197_v24  ;;  %3388 = vmatprep.mubr.msk.bf16.mxu0 %vm1425_vm3, %v2211_v10  ;;  %v2131_v19 = vadd.f32 %v3354_v18, %v1970_v2 }
 0x2d0   : > { %v1973_v3 = vadd.f32 %v3199_v22, %v4658_v4  ;;  %v2191_v27 = vmax.f32 %v2131_v19, 0.0 }
 0x2d1   : > { %v3200_v9 = vpop.f32.mrf.mxu1 }
 0x2d2   : > { %v2134_v47 = vadd.f32 %v3355_v36, %v1973_v3 }
 0x2d3   : > { %v3201_v45 = vpop.f32.mrf.mxu1 }
 0x2d4   : > { %v2192_v35 = vmax.f32 %v2134_v47, 0.0  ;;  %v3202_v39 = vadd.f32 %v3201_v45, %v3200_v9 }
 0x2d5   : > { %v3203_v63 = vpop.f32.mrf.mxu1 }
 0x2d6   : > { %v2212_v32 = vpack.c.bf16 %v2192_v35, %v2191_v27  ;;  %v1978_v60 = vadd.f32 %v3202_v39, %v4658_v4  ;;  %v3493_v27 = vld [vmem:[%s3616_s18 + $0x8] sm:$0xff]  }
 0x2d7   : > { %v3204_v29 = vpop.f32.mrf.mxu1  ;;  %v2451_v35 = vunpack.c.l.bf16 %v3493_v27 }
 0x2d8   : > { %3389 = vmatmul.mubr.msk.bf16.gmra.mxu0 %vm1425_vm3, %v2212_v32  ;;  %v3205_v20 = vadd.f32 %v3204_v29, %v3203_v63  ;;  %v3494_v32 = vld [vmem:[%s3616_s18] sm:$0xff]  }
 0x2d9   : > { %v3206_v51 = vpop.f32.mrf.mxu1  ;;  %v2449_v29 = vunpack.c.l.bf16 %v3494_v32 }
 0x2da   : > { %v1981_v41 = vadd.f32 %v3205_v20, %v4658_v4 }
 0x2db   : > { %v3207_v55 = vpop.f32.mrf.mxu1 }
 0x2dc   : > { %v3208_v44 = vadd.f32 %v3207_v55, %v3206_v51  ;;  %v2452_v55 = vunpack.c.h.bf16 %v3493_v27 }
 0x2dd   : > { %v3209_v42 = vpop.f32.mrf.mxu1 }
 0x2de   : > { %v1986_v58 = vadd.f32 %v3208_v44, %v4658_v4 }
 0x2df   : > { %v3210_v8 = vpop.f32.mrf.mxu1 }
 0x2e0   : > { %v3211_v37 = vadd.f32 %v3210_v8, %v3209_v42  ;;  %v2450_v8 = vunpack.c.h.bf16 %v3494_v32 }
 0x2e1   : > { %v3212_v33 = vpop.f32.mrf.mxu1 }
 0x2e2   : > { %v1989_v46 = vadd.f32 %v3211_v37, %v4658_v4 }
 0x2e3   : > { %v3213_v62 = vpop.f32.mrf.mxu1 }
 0x2e4   : > { %v3214_v23 = vadd.f32 %v3213_v62, %v3212_v33 }
 0x2e5   : > { %v3215_v54 = vpop.f32.mrf.mxu1 }
 0x2e6   : > { %v1994_v26 = vadd.f32 %v3214_v23, %v4658_v4 }
 0x2e7   : > { %v3216_v38 = vpop.f32.mrf.mxu1 }
 0x2e8   : > { %v3217_v16 = vadd.f32 %v3216_v38, %v3215_v54 }
 0x2ea   : > { %v3218_v28 = vpop.f32.mrf.mxu1  ;;  %v1997_v56 = vadd.f32 %v3217_v16, %v4658_v4 }
 0x2ec   : > { %v3219_v12 = vpop.f32.mrf.mxu1 }
 0x2ed   : > { %v3220_v11 = vadd.f32 %v3219_v12, %v3218_v28 }
 0x2ee   : > { %v3221_v59 = vpop.f32.mrf.mxu1 }
 0x2ef   : > { %v2002_v52 = vadd.f32 %v3220_v11, %v4658_v4 }
 0x2f0   : > { %v3222_v34 = vpop.f32.mrf.mxu1 }
 0x2f1   : > { %v3223_v57 = vadd.f32 %v3222_v34, %v3221_v59 }
 0x2f2   : > { %v3358_v14 = vpop.f32.mrf.mxu1 }
 0x2f3   : > { %v2147_v6 = vadd.f32 %v3358_v14, %v1986_v58  ;;  %v2005_v0 = vadd.f32 %v3223_v57, %v4658_v4  ;;  %v4711_v4 = vld [vmem:[%s4800_s7] ss:$0 sm:$0xff] }
 0x2f4   : > { %v2138_v21 = vpop.f32.mrf.mxu1 }
 0x2f5   : > { %v2139_v1 = vadd.f32 %v2138_v21, %v1978_v60  ;;  %v2195_v36 = vmax.f32 %v2147_v6, 0.0 }
 0x2f6   : > { %v3359_v61 = vpop.f32.mrf.mxu1 }
 0x2f7   : > { %v2150_v5 = vadd.f32 %v3359_v61, %v1989_v46  ;;  %v2193_v13 = vmax.f32 %v2139_v1, 0.0  ;;  %v3495_v46 = vld [vmem:[%s3616_s18 + $0x18] sm:$0xff]  }
 0x2f8   : > { %v2141_v18 = vpop.f32.mrf.mxu1  ;;  %v2455_v58 = vunpack.c.l.bf16 %v3495_v46  ;;  %v2456_v6 = vunpack.c.h.bf16 %v3495_v46 }
 0x2f9   : > { %v2142_v15 = vadd.f32 %v2141_v18, %v1981_v41  ;;  %v2196_v25 = vmax.f32 %v2150_v5, 0.0  ;;  %v3496_v5 = vld [vmem:[%s3616_s18 + $0x10] sm:$0xff]  }
 0x2fa   : > { %v3362_v48 = vpop.f32.mrf.mxu1  ;;  %v2453_v41 = vunpack.c.l.bf16 %v3496_v5 }
 0x2fb   : > { %v2194_v17 = vmax.f32 %v2142_v15, 0.0  ;;  %v2214_v7 = vpack.c.bf16 %v2196_v25, %v2195_v36  ;;  %v2163_v31 = vadd.f32 %v3362_v48, %v2002_v52  ;;  %v2454_v15 = vunpack.c.h.bf16 %v3496_v5 }
 0x2fc   : > { %v2154_v30 = vpop.f32.mrf.mxu1 }
 0x2fd   : > { %v2213_v53 = vpack.c.bf16 %v2194_v17, %v2193_v13  ;;  %v2155_v40 = vadd.f32 %v2154_v30, %v1994_v26  ;;  %v2199_v19 = vmax.f32 %v2163_v31, 0.0  ;;  %v3498_v31 = vld [vmem:[%s3616_s18 + $0x20] sm:$0xff]  }
 0x2fe   : > { %v3363_v49 = vpop.f32.mrf.mxu1 }
 0x2ff   : > { %v2166_v50 = vadd.f32 %v3363_v49, %v2005_v0  ;;  %3392 = vmatprep.mubr.msk.bf16.mxu0 %vm1425_vm3, %v2213_v53  ;;  %v2197_v43 = vmax.f32 %v2155_v40, 0.0  ;;  %v3497_v49 = vld [vmem:[%s3616_s18 + $0x28] sm:$0xff]  }
 0x300   : > { %v2157_v24 = vpop.f32.mrf.mxu1  ;;  %3393 = vmatmul.mubr.msk.bf16.gmra.mxu0 %vm1425_vm3, %v2214_v7  ;;  %v2459_v40 = vunpack.c.l.bf16 %v3497_v49 }
 0x301   : > { %v2158_v10 = vadd.f32 %v2157_v24, %v1997_v56  ;;  %v2200_v2 = vmax.f32 %v2166_v50, 0.0  ;;  %v2457_v24 = vunpack.c.l.bf16 %v3498_v31 }
 0x303   : > { %v2198_v22 = vmax.f32 %v2158_v10, 0.0  ;;  %v2216_v9 = vpack.c.bf16 %v2200_v2, %v2199_v19  ;;  %v2460_v10 = vunpack.c.h.bf16 %v3497_v49  ;;  %v2458_v19 = vunpack.c.h.bf16 %v3498_v31 }
 0x305   : > { %v2215_v3 = vpack.c.bf16 %v2198_v22, %v2197_v43 }
 0x307   : > { %3396 = vmatprep.mubr.msk.bf16.mxu0 %vm1425_vm3, %v2215_v3 }
 0x308   : > { %3397 = vmatmul.mubr.msk.bf16.gmra.mxu0 %vm1425_vm3, %v2216_v9 }
 0x323   : > { %v3370_v47 = vpop.f32.mrf.mxu0 }
 0x324   : > { %v2331_v45 = vadd.f32 %v3370_v47, %v4711_v4 }
 0x325   : > { %v2322_v63 = vpop.f32.mrf.mxu0 }
 0x326   : > { %v2323_v51 = vadd.f32 %v4711_v4, %v2322_v63  ;;  %v2483_v33 = vadd.f32 %v2451_v35, %v2331_v45 }
 0x327   : > { %v3371_v42 = vpop.f32.mrf.mxu0 }
 0x328   : > { %v2334_v62 = vadd.f32 %v3371_v42, %v4711_v4  ;;  %v2481_v38 = vadd.f32 %v2449_v29, %v2323_v51  ;;  %v2515_v59 = vmax.f32 %v2483_v33, 0.0  ;;  %v3499_v33 = vld [vmem:[%s3616_s18 + $0x38] sm:$0xff]  }
 0x329   : > { %v2325_v54 = vpop.f32.mrf.mxu0 }
 0x32a   : > { %v2484_v28 = vadd.f32 %v2452_v55, %v2334_v62  ;;  %v2326_v12 = vadd.f32 %v4711_v4, %v2325_v54  ;;  %v2513_v37 = vmax.f32 %v2481_v38, 0.0  ;;  %v2463_v62 = vunpack.c.l.bf16 %v3499_v33 }
 0x32c   : > { %v2516_v34 = vmax.f32 %v2484_v28, 0.0  ;;  %v2482_v39 = vadd.f32 %v2450_v8, %v2326_v12  ;;  %v3500_v28 = vld [vmem:[%s3616_s18 + $0x30] sm:$0xff]  }
 0x32d   : > { %v2461_v12 = vunpack.c.l.bf16 %v3500_v28 }
 0x32e   : > { %v2991_v44 = vpack.c.bf16 %v2516_v34, %v2515_v59  ;;  %v2514_v14 = vmax.f32 %v2482_v39, 0.0  ;;  %v2464_v59 = vunpack.c.h.bf16 %v3499_v33 }
 0x330   : > { %3063 = vst [vmem:[%s4724_s20 + $0x8] sm:$0xff] %v2991_v44   ;;  %v2986_v20 = vpack.c.bf16 %v2514_v14, %v2513_v37  ;;  %v2462_v44 = vunpack.c.h.bf16 %v3500_v28 }
 0x332   : > { %2987 = vst [vmem:[%s4724_s20] sm:$0xff] %v2986_v20  }
 0x338   : > { %v3374_v21 = vpop.f32.mrf.mxu0 }
 0x339   : > { %v2347_v60 = vadd.f32 %v3374_v21, %v4711_v4 }
 0x33a   : > { %v2338_v61 = vpop.f32.mrf.mxu0 }
 0x33b   : > { %v2339_v1 = vadd.f32 %v4711_v4, %v2338_v61  ;;  %v2487_v23 = vadd.f32 %v2455_v58, %v2347_v60 }
 0x33c   : > { %v3375_v18 = vpop.f32.mrf.mxu0 }
 0x33d   : > { %v2350_v57 = vadd.f32 %v3375_v18, %v4711_v4  ;;  %v2485_v25 = vadd.f32 %v2453_v41, %v2339_v1  ;;  %v2519_v13 = vmax.f32 %v2487_v23, 0.0 }
 0x33e   : > { %v2341_v11 = vpop.f32.mrf.mxu0 }
 0x33f   : > { %v2488_v48 = vadd.f32 %v2456_v6, %v2350_v57  ;;  %v2342_v16 = vadd.f32 %v4711_v4, %v2341_v11  ;;  %v2517_v30 = vmax.f32 %v2485_v25, 0.0  ;;  %v3501_v57 = vld [vmem:[%s3616_s18 + $0x48] sm:$0xff]  }
 0x341   : > { %v2520_v17 = vmax.f32 %v2488_v48, 0.0  ;;  %v2486_v36 = vadd.f32 %v2454_v15, %v2342_v16  ;;  %v2467_v15 = vunpack.c.l.bf16 %v3501_v57  ;;  %v3502_v48 = vld [vmem:[%s3616_s18 + $0x40] sm:$0xff]  }
 0x342   : > { %v2465_v16 = vunpack.c.l.bf16 %v3502_v48 }
 0x343   : > { %v3001_v53 = vpack.c.bf16 %v2520_v17, %v2519_v13  ;;  %v2518_v26 = vmax.f32 %v2486_v36, 0.0  ;;  %v2468_v13 = vunpack.c.h.bf16 %v3501_v57 }
 0x345   : > { %3065 = vst [vmem:[%s4724_s20 + $0x18] sm:$0xff] %v3001_v53   ;;  %v2996_v0 = vpack.c.bf16 %v2518_v26, %v2517_v30  ;;  %v2466_v53 = vunpack.c.h.bf16 %v3502_v48 }
 0x347   : > { %3064 = vst [vmem:[%s4724_s20 + $0x10] sm:$0xff] %v2996_v0  }
 0x350   : > { %v3378_v7 = vpop.f32.mrf.mxu0 }
 0x351   : > { %v2363_v52 = vadd.f32 %v3378_v7, %v4711_v4 }
 0x352   : > { %v2354_v50 = vpop.f32.mrf.mxu0 }
 0x353   : > { %v2355_v56 = vadd.f32 %v4711_v4, %v2354_v50  ;;  %v2491_v43 = vadd.f32 %v2459_v40, %v2363_v52 }
 0x354   : > { %v3379_v2 = vpop.f32.mrf.mxu0 }
 0x355   : > { %v2366_v22 = vadd.f32 %v3379_v2, %v4711_v4  ;;  %v2489_v9 = vadd.f32 %v2457_v24, %v2355_v56  ;;  %v2523_v27 = vmax.f32 %v2491_v43, 0.0 }
 0x356   : > { %v2357_v3 = vpop.f32.mrf.mxu0 }
 0x357   : > { %v2492_v47 = vadd.f32 %v2460_v10, %v2366_v22  ;;  %v2358_v45 = vadd.f32 %v4711_v4, %v2357_v3  ;;  %v2521_v32 = vmax.f32 %v2489_v9, 0.0  ;;  %v3503_v22 = vld [vmem:[%s3616_s18 + $0x58] sm:$0xff]  }
 0x359   : > { %v2524_v35 = vmax.f32 %v2492_v47, 0.0  ;;  %v2490_v63 = vadd.f32 %v2458_v19, %v2358_v45  ;;  %v2471_v19 = vunpack.c.l.bf16 %v3503_v22  ;;  %v3504_v47 = vld [vmem:[%s3616_s18 + $0x50] sm:$0xff]  }
 0x35a   : > { %v2469_v45 = vunpack.c.l.bf16 %v3504_v47 }
 0x35b   : > { %v3011_v29 = vpack.c.bf16 %v2524_v35, %v2523_v27  ;;  %v2522_v51 = vmax.f32 %v2490_v63, 0.0  ;;  %v2472_v27 = vunpack.c.h.bf16 %v3503_v22 }
 0x35d   : > { %3067 = vst [vmem:[%s4724_s20 + $0x28] sm:$0xff] %v3011_v29   ;;  %v3006_v55 = vpack.c.bf16 %v2522_v51, %v2521_v32  ;;  %v2470_v29 = vunpack.c.h.bf16 %v3504_v47 }
 0x35f   : > { %3066 = vst [vmem:[%s4724_s20 + $0x20] sm:$0xff] %v3006_v55  }
 0x368   : > { %v3382_v42 = vpop.f32.mrf.mxu0 }
 0x369   : > { %v2379_v8 = vadd.f32 %v3382_v42, %v4711_v4 }
 0x36a   : > { %v2370_v54 = vpop.f32.mrf.mxu0 }
 0x36b   : > { %v2371_v38 = vadd.f32 %v4711_v4, %v2370_v54  ;;  %v2495_v39 = vadd.f32 %v2463_v62, %v2379_v8 }
 0x36c   : > { %v3383_v34 = vpop.f32.mrf.mxu0 }
 0x36d   : > { %v2382_v37 = vadd.f32 %v3383_v34, %v4711_v4  ;;  %v2493_v20 = vadd.f32 %v2461_v12, %v2371_v38  ;;  %v2527_v46 = vmax.f32 %v2495_v39, 0.0 }
 0x36e   : > { %v2373_v14 = vpop.f32.mrf.mxu0 }
 0x36f   : > { %v2496_v21 = vadd.f32 %v2464_v59, %v2382_v37  ;;  %v2374_v60 = vadd.f32 %v4711_v4, %v2373_v14  ;;  %v2525_v1 = vmax.f32 %v2493_v20, 0.0  ;;  %v3505_v37 = vld [vmem:[%s3616_s18 + $0x68] sm:$0xff]  }
 0x371   : > { %v2528_v58 = vmax.f32 %v2496_v21, 0.0  ;;  %v2494_v61 = vadd.f32 %v2462_v44, %v2374_v60  ;;  %v2475_v44 = vunpack.c.l.bf16 %v3505_v37  ;;  %v3506_v21 = vld [vmem:[%s3616_s18 + $0x60] sm:$0xff]  }
 0x372   : > { %v2473_v60 = vunpack.c.l.bf16 %v3506_v21 }
 0x373   : > { %v3021_v5 = vpack.c.bf16 %v2528_v58, %v2527_v46  ;;  %v2526_v41 = vmax.f32 %v2494_v61, 0.0  ;;  %v2476_v46 = vunpack.c.h.bf16 %v3505_v37 }
 0x375   : > { %3069 = vst [vmem:[%s4724_s20 + $0x38] sm:$0xff] %v3021_v5   ;;  %v3016_v6 = vpack.c.bf16 %v2526_v41, %v2525_v1  ;;  %v2474_v5 = vunpack.c.h.bf16 %v3506_v21 }
 0x377   : > { %3068 = vst [vmem:[%s4724_s20 + $0x30] sm:$0xff] %v3016_v6  }
 0x380   : > { %v3386_v18 = vpop.f32.mrf.mxu0 }
 0x381   : > { %v2395_v23 = vadd.f32 %v3386_v18, %v4711_v4 }
 0x382   : > { %v2386_v11 = vpop.f32.mrf.mxu0 }
 0x383   : > { %v2387_v25 = vadd.f32 %v4711_v4, %v2386_v11  ;;  %v2499_v36 = vadd.f32 %v2467_v15, %v2395_v23  ;;  %v3507_v15 = vld [vmem:[%s3616_s18 + $0x78] sm:$0xff]  }
 0x384   : > { %v3387_v17 = vpop.f32.mrf.mxu0  ;;  %v2479_v11 = vunpack.c.l.bf16 %v3507_v15 }
 0x385   : > { %v2398_v30 = vadd.f32 %v3387_v17, %v4711_v4  ;;  %v2497_v0 = vadd.f32 %v2465_v16, %v2387_v25  ;;  %v2531_v49 = vmax.f32 %v2499_v36, 0.0  ;;  %v3508_v36 = vld [vmem:[%s3616_s18 + $0x70] sm:$0xff]  }
 0x386   : > { %v2389_v26 = vpop.f32.mrf.mxu0 }
 0x387   : > { %v2500_v7 = vadd.f32 %v2468_v13, %v2398_v30  ;;  %v2390_v52 = vadd.f32 %v4711_v4, %v2389_v26  ;;  %v2529_v56 = vmax.f32 %v2497_v0, 0.0  ;;  %v2477_v30 = vunpack.c.l.bf16 %v3508_v36 }
 0x389   : > { %v2532_v40 = vmax.f32 %v2500_v7, 0.0  ;;  %v2498_v50 = vadd.f32 %v2466_v53, %v2390_v52  ;;  %v2480_v53 = vunpack.c.h.bf16 %v3507_v15 }
 0x38b   : > { %v3031_v31 = vpack.c.bf16 %v2532_v40, %v2531_v49  ;;  %v2530_v24 = vmax.f32 %v2498_v50, 0.0 }
 0x38d   : > { %3071 = vst [vmem:[%s4724_s20 + $0x48] sm:$0xff] %v3031_v31   ;;  %v3026_v10 = vpack.c.bf16 %v2530_v24, %v2529_v56  ;;  %v2478_v31 = vunpack.c.h.bf16 %v3508_v36 }
 0x38f   : > { %3070 = vst [vmem:[%s4724_s20 + $0x40] sm:$0xff] %v3026_v10  }
 0x398   : > { %v3390_v2 = vpop.f32.mrf.mxu0 }
 0x399   : > { %v2411_v43 = vadd.f32 %v3390_v2, %v4711_v4 }
 0x39a   : > { %v2402_v3 = vpop.f32.mrf.mxu0 }
 0x39b   : > { %v2403_v9 = vadd.f32 %v4711_v4, %v2402_v3  ;;  %v2503_v63 = vadd.f32 %v2471_v19, %v2411_v43 }
 0x39c   : > { %v3391_v35 = vpop.f32.mrf.mxu0 }
 0x39d   : > { %v2414_v32 = vadd.f32 %v3391_v35, %v4711_v4  ;;  %v2501_v55 = vadd.f32 %v2469_v45, %v2403_v9  ;;  %v2535_v33 = vmax.f32 %v2503_v63, 0.0 }
 0x39e   : > { %v2405_v51 = vpop.f32.mrf.mxu0 }
 0x39f   : > { %v2504_v42 = vadd.f32 %v2472_v27, %v2414_v32  ;;  %v2406_v8 = vadd.f32 %v4711_v4, %v2405_v51  ;;  %v2533_v38 = vmax.f32 %v2501_v55, 0.0 }
 0x3a1   : > { %v2536_v62 = vmax.f32 %v2504_v42, 0.0  ;;  %v2502_v54 = vadd.f32 %v2470_v29, %v2406_v8 }
 0x3a3   : > { %v3041_v28 = vpack.c.bf16 %v2536_v62, %v2535_v33  ;;  %v2534_v12 = vmax.f32 %v2502_v54, 0.0 }
 0x3a5   : > { %3073 = vst [vmem:[%s4724_s20 + $0x58] sm:$0xff] %v3041_v28   ;;  %v3036_v59 = vpack.c.bf16 %v2534_v12, %v2533_v38 }
 0x3a7   : > { %3072 = vst [vmem:[%s4724_s20 + $0x50] sm:$0xff] %v3036_v59  }
 0x3c0   : > { %v3394_v34 = vpop.f32.mrf.mxu0 }
 0x3c1   : > { %v2427_v39 = vadd.f32 %v3394_v34, %v4711_v4 }
 0x3c2   : > { %v2418_v14 = vpop.f32.mrf.mxu0 }
 0x3c3   : > { %v2419_v20 = vadd.f32 %v4711_v4, %v2418_v14  ;;  %v2507_v61 = vadd.f32 %v2475_v44, %v2427_v39 }
 0x3c4   : > { %v3395_v58 = vpop.f32.mrf.mxu0 }
 0x3c5   : > { %v2430_v1 = vadd.f32 %v3395_v58, %v4711_v4  ;;  %v2505_v6 = vadd.f32 %v2473_v60, %v2419_v20  ;;  %v2539_v25 = vmax.f32 %v2507_v61, 0.0 }
 0x3c6   : > { %v2421_v41 = vpop.f32.mrf.mxu0 }
 0x3c7   : > { %v2508_v18 = vadd.f32 %v2476_v46, %v2430_v1  ;;  %v2422_v23 = vadd.f32 %v4711_v4, %v2421_v41  ;;  %v2537_v26 = vmax.f32 %v2505_v6, 0.0 }
 0x3c8   : > { %v3398_v57 = vpop.f32.mrf.mxu0 }
 0x3c9   : > { %v2540_v48 = vmax.f32 %v2508_v18, 0.0  ;;  %v2506_v16 = vadd.f32 %v2474_v5, %v2422_v23  ;;  %v2443_v13 = vadd.f32 %v3398_v57, %v4711_v4 }
 0x3ca   : > { %v2434_v17 = vpop.f32.mrf.mxu0 }
 0x3cb   : > { %v3051_v0 = vpack.c.bf16 %v2540_v48, %v2539_v25  ;;  %v2538_v7 = vmax.f32 %v2506_v16, 0.0  ;;  %v2435_v52 = vadd.f32 %v4711_v4, %v2434_v17  ;;  %v2511_v50 = vadd.f32 %v2479_v11, %v2443_v13 }
 0x3cc   : > { %v3399_v49 = vpop.f32.mrf.mxu0 }
 0x3cd   : > { %3075 = vst [vmem:[%s4724_s20 + $0x68] sm:$0xff] %v3051_v0   ;;  %v3046_v40 = vpack.c.bf16 %v2538_v7, %v2537_v26  ;;  %v2446_v56 = vadd.f32 %v3399_v49, %v4711_v4  ;;  %v2509_v10 = vadd.f32 %v2477_v30, %v2435_v52  ;;  %v2543_v22 = vmax.f32 %v2511_v50, 0.0 }
 0x3ce   : > { %v2437_v24 = vpop.f32.mrf.mxu0 }
 0x3cf   : > { %3074 = vst [vmem:[%s4724_s20 + $0x60] sm:$0xff] %v3046_v40   ;;  %v2512_v2 = vadd.f32 %v2480_v53, %v2446_v56  ;;  %v2438_v43 = vadd.f32 %v4711_v4, %v2437_v24  ;;  %v2541_v9 = vmax.f32 %v2509_v10, 0.0 }
 0x3d1   : > { %v2544_v19 = vmax.f32 %v2512_v2, 0.0  ;;  %v2510_v3 = vadd.f32 %v2478_v31, %v2438_v43 }
 0x3d3   : > { %v3061_v47 = vpack.c.bf16 %v2544_v19, %v2543_v22  ;;  %v2542_v45 = vmax.f32 %v2510_v3, 0.0 }
 0x3d5   : > { %3077 = vst [vmem:[%s4724_s20 + $0x78] sm:$0xff] %v3061_v47   ;;  %v3056_v27 = vpack.c.bf16 %v2542_v45, %v2541_v9 }
 0x3d7   : > { %3076 = vst [vmem:[%s4724_s20 + $0x70] sm:$0xff] %v3056_v27  }
 0x3d8 PF: > { %s18_s29 = sadd.s32 1, %s3531_s29   ;;  %s4824_s27 = smov %s3527_s28 }
 0x3d9   : > { %p15_p5 = scmp.ge.s32.totalorder %s18_s29, 4   ;;  %s4825_s28 = smov %s4827_s30 }
 0x3db   :  { %17 = sbr.rel (!%p15_p5) target bundleno = 2 (0x2), region = 85 }

</bundles_post_ra>
